<compile_context>
chip_gen: v7x
topology: tpu7x:2x2x1
jax: 0.10.0
libtpu: 0.0.40
codegen_flags: <defaults>
</compile_context>

<pallas_src>
import functools

import jax
import jax.numpy as jnp
import numpy as np
from jax.experimental import pallas as pl
from jax.experimental.pallas import tpu as pltpu

EPS = 1e-5  # nn.LayerNorm default eps


# ----------------------------------------------------------------------------
# Helpers
# ----------------------------------------------------------------------------
def _pick_row_tile(n, max_tile=256):
    """Largest row-tile <= max_tile that divides n (multiple of 8), else n."""
    if n <= max_tile:
        return n
    for t in range(max_tile, 7, -8):
        if n % t == 0:
            return t
    return n


def _pick_f_tile(f, max_tile=2048):
    """Largest FFN-hidden tile <= max_tile that divides f (multiple of 128)."""
    if f <= max_tile:
        return f
    for t in range(max_tile, 127, -128):
        if f % t == 0:
            return t
    return f


def _vmem_limit_bytes():
    """~100 MiB on 128-MiB-VMEM chips (v5e/v6e), ~56 MiB on v7x (64 MiB)."""
    cap = 128 * 1024 * 1024
    try:
        info = pltpu.get_tpu_info()
        cap = int(getattr(info, "vmem_capacity_bytes", cap) or cap)
    except Exception:
        pass
    return int(min(100 * 1024 * 1024, cap * 7 // 8))


# ----------------------------------------------------------------------------
# Pallas kernels
# ----------------------------------------------------------------------------
def _attn_ln_kernel(x_ref, kv_ref, mask_ref,
                    wq_ref, bq_ref, wkv_ref, bkv_ref, wo_ref, bo_ref,
                    g_ref, beta_ref,
                    out_ref, k_out_ref, v_out_ref,
                    kT_sc, v_sc, o_sc,
                    *, num_heads, head_dim):
    """Multi-head attention for one (batch, query-block) grid point, with the
    residual-add + LayerNorm epilogue fused in. K/V projections are computed
    once per batch element (t == 0): K is cached transposed (D, S) in a bf16
    VMEM scratch (lane-dense for QK^T), V in a bf16 (S, D) scratch, and both
    are also written to the bf16 K/V cache outputs."""
    D = num_heads * head_dim
    x_b = x_ref[0]                       # (tq, D) bf16
    x = x_b.astype(jnp.float32)          # residual in f32
    mask = mask_ref[0, 0]                # (tq, S) f32

    # --- K / V projection (fused (D, 2D) matmul), only on the first q-block ---
    @pl.when(pl.program_id(1) == 0)
    def _():
        kv_b = kv_ref[0]                                             # (S, D) bf16
        kvp = jnp.dot(kv_b, wkv_ref[...],
                      preferred_element_type=jnp.float32) + bkv_ref[...]  # (S, 2D)
        k_bf = kvp[:, :D].astype(jnp.bfloat16)
        v_bf = kvp[:, D:].astype(jnp.bfloat16)
        k_out_ref[0] = k_bf
        v_out_ref[0] = v_bf
        v_sc[...] = v_bf
        kT_sc[...] = k_bf.T                                          # (D, S)

    # --- Q projection (1/sqrt(hd) scaling pre-folded into wq / bq) ---
    q = jnp.dot(x_b, wq_ref[...],
                preferred_element_type=jnp.float32) + bq_ref[...]    # (tq, D) f32
    q_b = q.astype(jnp.bfloat16)

    # --- per-head softmax(QK^T + mask) V into a (tq, D) scratch accumulator ---
    for h in range(num_heads):
        lo = h * head_dim
        qh = q_b[:, lo:lo + head_dim]                # (tq, hd) bf16
        kTh = kT_sc[lo:lo + head_dim, :]             # (hd, S)  bf16 (pre-transposed)
        vh = v_sc[:, lo:lo + head_dim]               # (S, hd)  bf16
        s = jnp.dot(qh, kTh, preferred_element_type=jnp.float32) + mask   # (tq, S)
        m = jnp.max(s, axis=-1, keepdims=True)
        p = jnp.exp(s - m)                           # unnormalized probs
        l = jnp.sum(p, axis=-1, keepdims=True)
        ph = jnp.dot(p.astype(jnp.bfloat16), vh,
                     preferred_element_type=jnp.float32)             # (tq, hd)
        # normalize AFTER PV on the small (tq, hd) tile
        o_sc[:, lo:lo + head_dim] = ph * pl.reciprocal(l, approx=True)

    # --- single D-contraction output projection ---
    attn = jnp.dot(o_sc[...].astype(jnp.bfloat16), wo_ref[...],
                   preferred_element_type=jnp.float32) + bo_ref[...]  # (tq, D)

    # --- fused residual add + LayerNorm epilogue ---
    hres = x + attn
    mean = jnp.mean(hres, axis=-1, keepdims=True)
    var = jnp.mean((hres - mean) ** 2, axis=-1, keepdims=True)
    out_ref[0] = ((hres - mean) * jax.lax.rsqrt(var + EPS)
                  * g_ref[...] + beta_ref[...]).astype(out_ref.dtype)


def _ffn_ln_kernel(x_ref, w1_ref, b1_ref, w2_ref, b2_ref, g_ref, beta_ref,
                   out_ref, acc_ref):
    """fc2(gelu(fc1(x))) + x, then final LayerNorm. Grid is (row-block, F-chunk);
    partial fc1->gelu->fc2 results accumulate in an f32 (rows, D) scratch so the
    full (rows, F) intermediate is never live; epilogue runs on the last chunk."""
    f = pl.program_id(1)
    x_b = x_ref[...]                                    # (rows, D) bf16

    @pl.when(f == 0)
    def _():
        acc_ref[...] = jnp.zeros_like(acc_ref)

    h = jnp.dot(x_b, w1_ref[...],
                preferred_element_type=jnp.float32) + b1_ref[...]     # (rows, f_tile)
    # exact (erf) gelu, matching ACT2FN["gelu"]
    h = 0.5 * h * (1.0 + jax.lax.erf(h * 0.7071067811865476))
    acc_ref[...] += jnp.dot(h.astype(jnp.bfloat16), w2_ref[...],
                            preferred_element_type=jnp.float32)       # (rows, D)

    @pl.when(f == pl.num_programs(1) - 1)
    def _():
        hres = acc_ref[...] + b2_ref[...] + x_b.astype(jnp.float32)
        mean = jnp.mean(hres, axis=-1, keepdims=True)
        var = jnp.mean((hres - mean) ** 2, axis=-1, keepdims=True)
        out_ref[...] = ((hres - mean) * jax.lax.rsqrt(var + EPS)
                        * g_ref[...] + beta_ref[...]).astype(out_ref.dtype)


# ----------------------------------------------------------------------------
# Pallas wrappers
# ----------------------------------------------------------------------------
def bart_attention_ln_pallas(x, kv, mask, wq, bq, wkv, bkv, wo, bo, gamma, beta,
                             num_heads, *, tq=None):
    """Attention (self or cross) + residual + LayerNorm.

    x / kv are bf16 (B, T, D) / (B, S, D); mask is f32 additive (B, 1, T, S).
    Returns (post-LN hidden bf16, K bf16 (B,S,D), V bf16 (B,S,D))."""
    B, T, D = x.shape
    S = kv.shape[1]
    head_dim = D // num_heads
    if tq is None:
        tq = _pick_row_tile(T, 256)

    kernel = functools.partial(_attn_ln_kernel, num_heads=num_heads,
                               head_dim=head_dim)
    wmap = lambda b, t: (0, 0)
    single = pl.Buffered(1)   # constant-index blocks: no double-buffering
    grid_spec = pltpu.PrefetchScalarGridSpec(
        num_scalar_prefetch=0,
        grid=(B, T // tq),
        in_specs=[
            pl.BlockSpec((1, tq, D), lambda b, t: (b, t, 0)),            # x (query block)
            pl.BlockSpec((1, S, D), lambda b, t: (b, 0, 0),
                         pipeline_mode=single),                          # kv source
            pl.BlockSpec((1, 1, tq, S), lambda b, t: (b, 0, t, 0)),      # additive mask
            pl.BlockSpec((D, D), wmap, pipeline_mode=single),            # wq
            pl.BlockSpec((1, D), wmap, pipeline_mode=single),            # bq
            pl.BlockSpec((D, 2 * D), wmap, pipeline_mode=single),        # wkv
            pl.BlockSpec((1, 2 * D), wmap, pipeline_mode=single),        # bkv
            pl.BlockSpec((D, D), wmap, pipeline_mode=single),            # wo
            pl.BlockSpec((1, D), wmap, pipeline_mode=single),            # bo
            pl.BlockSpec((1, D), wmap, pipeline_mode=single),            # ln gamma
            pl.BlockSpec((1, D), wmap, pipeline_mode=single),            # ln beta
        ],
        out_specs=(
            pl.BlockSpec((1, tq, D), lambda b, t: (b, t, 0)),            # post-LN hidden
            pl.BlockSpec((1, S, D), lambda b, t: (b, 0, 0)),             # K cache (bf16)
            pl.BlockSpec((1, S, D), lambda b, t: (b, 0, 0)),             # V cache (bf16)
        ),
        scratch_shapes=[
            pltpu.VMEM((D, S), jnp.bfloat16),    # K^T, written at t==0, reused over t
            pltpu.VMEM((S, D), jnp.bfloat16),    # V, written at t==0, reused over t
            pltpu.VMEM((tq, D), jnp.float32),    # per-head output accumulator
        ],
    )
    out_shape = (
        jax.ShapeDtypeStruct((B, T, D), jnp.bfloat16),
        jax.ShapeDtypeStruct((B, S, D), jnp.bfloat16),
        jax.ShapeDtypeStruct((B, S, D), jnp.bfloat16),
    )
    return pl.pallas_call(
        kernel,
        out_shape=out_shape,
        grid_spec=grid_spec,
        compiler_params=pltpu.CompilerParams(
            dimension_semantics=("parallel", "arbitrary"),
            vmem_limit_bytes=_vmem_limit_bytes()),
    )(x, kv, mask, wq, bq, wkv, bkv, wo, bo, gamma, beta)


def ffn_layernorm_pallas(x2d, w1, b1, w2, b2, gamma, beta, *,
                         row_tile=None, f_tile=None):
    """x2d is bf16 (N, D). Returns f32 (N, D) = LN(x + fc2(gelu(fc1(x))))."""
    N, D = x2d.shape
    F = w1.shape[1]
    if row_tile is None:
        row_tile = _pick_row_tile(N, 256)
    if f_tile is None:
        f_tile = _pick_f_tile(F, 2048)
    cmap = lambda i, f: (0, 0)
    single = pl.Buffered(1)
    return pl.pallas_call(
        _ffn_ln_kernel,
        out_shape=jax.ShapeDtypeStruct((N, D), jnp.float32),
        grid_spec=pltpu.PrefetchScalarGridSpec(
            num_scalar_prefetch=0,
            grid=(N // row_tile, F // f_tile),
            in_specs=[
                pl.BlockSpec((row_tile, D), lambda i, f: (i, 0)),        # x rows
                pl.BlockSpec((D, f_tile), lambda i, f: (0, f)),          # fc1 W chunk
                pl.BlockSpec((1, f_tile), lambda i, f: (0, f)),          # fc1 b chunk
                pl.BlockSpec((f_tile, D), lambda i, f: (f, 0)),          # fc2 W chunk
                pl.BlockSpec((1, D), cmap, pipeline_mode=single),        # fc2 b
                pl.BlockSpec((1, D), cmap, pipeline_mode=single),        # ln gamma
                pl.BlockSpec((1, D), cmap, pipeline_mode=single),        # ln beta
            ],
            out_specs=pl.BlockSpec((row_tile, D), lambda i, f: (i, 0)),
            scratch_shapes=[pltpu.VMEM((row_tile, D), jnp.float32)],
        ),
        compiler_params=pltpu.CompilerParams(
            dimension_semantics=("parallel", "arbitrary"),
            vmem_limit_bytes=_vmem_limit_bytes()),
    )(x2d, w1, b1, w2, b2, gamma, beta)


def _shape_kv(x, num_heads):
    # (B, S, D) -> (B, H, S, head_dim), matching BartAttention._shape
    B, S, D = x.shape
    hd = D // num_heads
    return x.reshape(B, S, num_heads, hd).transpose(0, 2, 1, 3)


def prepare_kernel_params(params, num_heads, embed_dim):
    """One-time host-side weight transform: fold scaling into Wq/bq, fuse K|V
    weights, cast matmul weights to bf16 (biases / LN params stay f32)."""
    hd = embed_dim // num_heads
    scaling = hd ** (-0.5)

    def prep_attn(prefix):
        wq, bq = params[prefix + "_q"]
        wk, bk = params[prefix + "_k"]
        wv, bv = params[prefix + "_v"]
        wo, bo = params[prefix + "_o"]
        wq_s = (wq * scaling).astype(jnp.bfloat16)
        bq_s = bq * scaling
        wkv = jnp.concatenate([wk, wv], axis=1).astype(jnp.bfloat16)
        bkv = jnp.concatenate([bk, bv], axis=1)
        return (wq_s, bq_s, wkv, bkv, wo.astype(jnp.bfloat16), bo)

    kp = {"sa": prep_attn("sa"), "ca": prep_attn("ca")}
    kp["fc1_w"] = params["fc1"][0].astype(jnp.bfloat16)
    kp["fc1_b"] = params["fc1"][1]
    kp["fc2_w"] = params["fc2"][0].astype(jnp.bfloat16)
    kp["fc2_b"] = params["fc2"][1]
    kp["ln_sa"] = params["ln_sa"]
    kp["ln_ca"] = params["ln_ca"]
    kp["ln_f"] = params["ln_f"]
    return kp


def bart_decoder_layer(hidden, attn_mask, enc_hidden, enc_mask, kparams, num_heads):
    """Full BartDecoderLayer forward (eval mode, no past_key_value)."""
    B, T, D = hidden.shape

    hidden_bf = hidden.astype(jnp.bfloat16)
    enc_bf = enc_hidden.astype(jnp.bfloat16)

    # --- self attention + residual + layernorm (fused) ---
    wq, bq, wkv, bkv, wo, bo = kparams["sa"]
    g, b = kparams["ln_sa"]
    h, k_sa, v_sa = bart_attention_ln_pallas(
        hidden_bf, hidden_bf, attn_mask, wq, bq, wkv, bkv, wo, bo, g, b, num_heads)

    # --- cross attention + residual + layernorm (fused) ---
    wq, bq, wkv, bkv, wo, bo = kparams["ca"]
    g, b = kparams["ln_ca"]
    h2, k_ca, v_ca = bart_attention_ln_pallas(
        h, enc_bf, enc_mask, wq, bq, wkv, bkv, wo, bo, g, b, num_heads)

    # --- feed-forward + residual + final layernorm (fused, row x F-chunk tiled) ---
    g, b = kparams["ln_f"]
    out = ffn_layernorm_pallas(h2.reshape(B * T, D),
                               kparams["fc1_w"], kparams["fc1_b"],
                               kparams["fc2_w"], kparams["fc2_b"],
                               g, b).reshape(B, T, D)

    # present_key_value in the module's (B, H, S, head_dim) layout (bf16 cache).
    present_key_value = (_shape_kv(k_sa, num_heads), _shape_kv(v_sa, num_heads),
                         _shape_kv(k_ca, num_heads), _shape_kv(v_ca, num_heads))
    return out, present_key_value


# ----------------------------------------------------------------------------
# Pure-JAX reference (mirrors the PyTorch forward in eval mode, f32 weights)
# ----------------------------------------------------------------------------
def _ref_attention(x, kv, mask, wq, bq, wk, bk, wv, bv, wo, bo, num_heads):
    B, T, D = x.shape
    S = kv.shape[1]
    hd = D // num_heads
    q = (x @ wq + bq) * (hd ** -0.5)
    k = kv @ wk + bk
    v = kv @ wv + bv
    qh = q.reshape(B, T, num_heads, hd).transpose(0, 2, 1, 3)
    kh = k.reshape(B, S, num_heads, hd).transpose(0, 2, 1, 3)
    vh = v.reshape(B, S, num_heads, hd).transpose(0, 2, 1, 3)
    s = jnp.einsum("bhtd,bhsd->bhts", qh, kh) + mask
    p = jax.nn.softmax(s, axis=-1)
    o = jnp.einsum("bhts,bhsd->bhtd", p, vh)
    o = o.transpose(0, 2, 1, 3).reshape(B, T, D)
    return o @ wo + bo


def _ref_ln(x, g, b):
    mean = jnp.mean(x, axis=-1, keepdims=True)
    var = jnp.mean((x - mean) ** 2, axis=-1, keepdims=True)
    return (x - mean) * jax.lax.rsqrt(var + EPS) * g + b


def reference_forward(hidden, attn_mask, enc_hidden, enc_mask, params, num_heads):
    wq, bq = params["sa_q"]; wk, bk = params["sa_k"]
    wv, bv = params["sa_v"]; wo, bo = params["sa_o"]
    h = _ref_attention(hidden, hidden, attn_mask, wq, bq, wk, bk, wv, bv, wo, bo,
                       num_heads)
    h = _ref_ln(hidden + h, *params["ln_sa"])

    wq, bq = params["ca_q"]; wk, bk = params["ca_k"]
    wv, bv = params["ca_v"]; wo, bo = params["ca_o"]
    c = _ref_attention(h, enc_hidden, enc_mask, wq, bq, wk, bk, wv, bv, wo, bo,
                       num_heads)
    h = _ref_ln(h + c, *params["ln_ca"])

    w1, b1 = params["fc1"]; w2, b2 = params["fc2"]
    f = h @ w1 + b1
    f = 0.5 * f * (1.0 + jax.lax.erf(f * 0.7071067811865476))
    f = f @ w2 + b2
    return _ref_ln(h + f, *params["ln_f"])


# ----------------------------------------------------------------------------
# Deterministic parameter init + driver
# ----------------------------------------------------------------------------
def init_params(key, D, F):
    ks = jax.random.split(key, 16)

    def lin(k, i, o):
        kw, kb = jax.random.split(k)
        return (0.05 * jax.random.normal(kw, (i, o), jnp.float32),
                0.05 * jax.random.normal(kb, (1, o), jnp.float32))

    params = {}
    names = ["sa_q", "sa_k", "sa_v", "sa_o", "ca_q", "ca_k", "ca_v", "ca_o"]
    for idx, name in enumerate(names):
        params[name] = lin(ks[idx], D, D)
    params["fc1"] = lin(ks[8], D, F)
    params["fc2"] = lin(ks[9], F, D)
    for idx, name in enumerate(["ln_sa", "ln_ca", "ln_f"]):
        kg, kb = jax.random.split(ks[10 + idx])
        params[name] = (1.0 + 0.1 * jax.random.normal(kg, (1, D), jnp.float32),
                        0.1 * jax.random.normal(kb, (1, D), jnp.float32))
    return params


if __name__ == "__main__":
    B, T, S, D, H, FFN = 2, 8, 10, 32, 4, 64

    key = jax.random.PRNGKey(0)
    k_h, k_e, k_p = jax.random.split(key, 3)

    hidden = jax.random.normal(k_h, (B, T, D), jnp.float32)
    enc_hidden = jax.random.normal(k_e, (B, S, D), jnp.float32)

    # causal decoder self-attention mask (B, 1, T, T): 0 where allowed, -1e9 else
    causal = jnp.where(jnp.arange(T)[:, None] >= jnp.arange(T)[None, :], 0.0, -1e9)
    attn_mask = jnp.broadcast_to(causal, (B, 1, T, T)).astype(jnp.float32)

    # encoder (cross-attention) padding mask (B, 1, T, S): mask the last two
    # encoder positions of batch element 1.
    enc_mask = np.zeros((B, 1, T, S), np.float32)
    enc_mask[1, :, :, -2:] = -1e9
    enc_mask = jnp.asarray(enc_mask)

    params = init_params(k_p, D, FFN)
    kparams = prepare_kernel_params(params, H, D)

    out, present_kv = bart_decoder_layer(hidden, attn_mask, enc_hidden, enc_mask,
                                         kparams, H)
    out = jax.block_until_ready(out)

    ref = reference_forward(hidden, attn_mask, enc_hidden, enc_mask, params, H)
    np.testing.assert_allclose(np.asarray(out), np.asarray(ref),
                               rtol=5e-2, atol=5e-2)
    assert present_kv[0].shape == (B, H, T, D // H)
    assert present_kv[2].shape == (B, H, S, D // H)

    print("KERNEL_OK")
</pallas_src>

<mosaic_0001>
module attributes {stable_mosaic.version = 11 : i64} {
  func.func @_attn_ln_kernel(%arg0: i32, %arg1: i32, %arg2: memref<1x8x32xbf16, #tpu.memory_space<vmem>>, %arg3: memref<1x8x32xbf16, #tpu.memory_space<vmem>>, %arg4: memref<1x1x8x8xf32, #tpu.memory_space<vmem>>, %arg5: memref<32x32xbf16, #tpu.memory_space<vmem>>, %arg6: memref<1x32xf32, #tpu.memory_space<vmem>>, %arg7: memref<32x64xbf16, #tpu.memory_space<vmem>>, %arg8: memref<1x64xf32, #tpu.memory_space<vmem>>, %arg9: memref<32x32xbf16, #tpu.memory_space<vmem>>, %arg10: memref<1x32xf32, #tpu.memory_space<vmem>>, %arg11: memref<1x32xf32, #tpu.memory_space<vmem>>, %arg12: memref<1x32xf32, #tpu.memory_space<vmem>>, %arg13: memref<1x8x32xbf16, #tpu.memory_space<vmem>>, %arg14: memref<1x8x32xbf16, #tpu.memory_space<vmem>>, %arg15: memref<1x8x32xbf16, #tpu.memory_space<vmem>>, %arg16: memref<32x8xbf16, #tpu.memory_space<vmem>>, %arg17: memref<8x32xbf16, #tpu.memory_space<vmem>>, %arg18: memref<8x32xf32, #tpu.memory_space<vmem>>) attributes {dimension_semantics = [#tpu.dimension_semantics<parallel>, #tpu.dimension_semantics<arbitrary>], iteration_bounds = array<i64: 2, 1>, scalar_prefetch = 0 : i64, scratch_operands = 3 : i64, tpu.core_type = #tpu.core_type<tc>, window_params = [{transform_indices = @transform_0, window_bounds = array<i64: 1, 8, 32>}, {pipeline_mode = #tpu.pipeline_mode<synchronous>, transform_indices = @transform_1, window_bounds = array<i64: 1, 8, 32>}, {transform_indices = @transform_2, window_bounds = array<i64: 1, 1, 8, 8>}, {pipeline_mode = #tpu.pipeline_mode<synchronous>, transform_indices = @transform_3, window_bounds = array<i64: 32, 32>}, {pipeline_mode = #tpu.pipeline_mode<synchronous>, transform_indices = @transform_4, window_bounds = array<i64: 1, 32>}, {pipeline_mode = #tpu.pipeline_mode<synchronous>, transform_indices = @transform_5, window_bounds = array<i64: 32, 64>}, {pipeline_mode = #tpu.pipeline_mode<synchronous>, transform_indices = @transform_6, window_bounds = array<i64: 1, 64>}, {pipeline_mode = #tpu.pipeline_mode<synchronous>, transform_indices = @transform_7, window_bounds = array<i64: 32, 32>}, {pipeline_mode = #tpu.pipeline_mode<synchronous>, transform_indices = @transform_8, window_bounds = array<i64: 1, 32>}, {pipeline_mode = #tpu.pipeline_mode<synchronous>, transform_indices = @transform_9, window_bounds = array<i64: 1, 32>}, {pipeline_mode = #tpu.pipeline_mode<synchronous>, transform_indices = @transform_10, window_bounds = array<i64: 1, 32>}, {transform_indices = @transform_11, window_bounds = array<i64: 1, 8, 32>}, {transform_indices = @transform_12, window_bounds = array<i64: 1, 8, 32>}, {transform_indices = @transform_13, window_bounds = array<i64: 1, 8, 32>}]} {
    %c0 = arith.constant 0 : index
    %c0_0 = arith.constant 0 : index
    %c0_1 = arith.constant 0 : index
    %0 = vector.load %arg2[%c0, %c0_0, %c0_1] : memref<1x8x32xbf16, #tpu.memory_space<vmem>>, vector<1x8x32xbf16>
    %1 = vector.shape_cast %0 : vector<1x8x32xbf16> to vector<8x32xbf16>
    %2 = arith.extf %1 : vector<8x32xbf16> to vector<8x32xf32>
    %c0_2 = arith.constant 0 : index
    %c0_3 = arith.constant 0 : index
    %c0_4 = arith.constant 0 : index
    %c0_5 = arith.constant 0 : index
    %3 = vector.load %arg4[%c0_2, %c0_3, %c0_4, %c0_5] : memref<1x1x8x8xf32, #tpu.memory_space<vmem>>, vector<1x1x8x8xf32>
    %4 = vector.shape_cast %3 : vector<1x1x8x8xf32> to vector<8x8xf32>
    %c0_i32 = arith.constant 0 : i32
    %5 = arith.cmpi eq, %arg1, %c0_i32 : i32
    %6 = arith.extui %5 : i1 to i32
    %c0_i32_6 = arith.constant 0 : i32
    %7 = arith.cmpi ne, %6, %c0_i32_6 : i32
    scf.if %7 {
      %c0_67 = arith.constant 0 : index
      %c0_68 = arith.constant 0 : index
      %c0_69 = arith.constant 0 : index
      %122 = vector.load %arg3[%c0_67, %c0_68, %c0_69] : memref<1x8x32xbf16, #tpu.memory_space<vmem>>, vector<1x8x32xbf16>
      %123 = vector.shape_cast %122 : vector<1x8x32xbf16> to vector<8x32xbf16>
      %c0_70 = arith.constant 0 : index
      %c0_71 = arith.constant 0 : index
      %124 = vector.load %arg7[%c0_70, %c0_71] : memref<32x64xbf16, #tpu.memory_space<vmem>>, vector<32x64xbf16>
      %cst_72 = arith.constant dense<0.000000e+00> : vector<8x64xf32>
      %125 = tpu.matmul %123, %124, %cst_72 {dimension_numbers = #tpu.dot_dimension_numbers<[1], [0], [0], [1], [0, 0, 1, 1], [], []>} : vector<8x32xbf16>, vector<32x64xbf16>, vector<8x64xf32> -> vector<8x64xf32>
      %c0_73 = arith.constant 0 : index
      %c0_74 = arith.constant 0 : index
      %126 = vector.load %arg8[%c0_73, %c0_74] : memref<1x64xf32, #tpu.memory_space<vmem>>, vector<1x64xf32>
      %127 = vector.broadcast %126 : vector<1x64xf32> to vector<8x64xf32>
      %128 = arith.addf %125, %127 : vector<8x64xf32>
      %129 = vector.extract_strided_slice %128 {offsets = [0, 0], sizes = [8, 32], strides = [1, 1]} : vector<8x64xf32> to vector<8x32xf32>
      %130 = arith.truncf %129 : vector<8x32xf32> to vector<8x32xbf16>
      %131 = vector.extract_strided_slice %128 {offsets = [0, 32], sizes = [8, 32], strides = [1, 1]} : vector<8x64xf32> to vector<8x32xf32>
      %132 = arith.truncf %131 : vector<8x32xf32> to vector<8x32xbf16>
      %c0_75 = arith.constant 0 : index
      %c0_76 = arith.constant 0 : index
      %c0_77 = arith.constant 0 : index
      %133 = vector.load %arg14[%c0_75, %c0_76, %c0_77] : memref<1x8x32xbf16, #tpu.memory_space<vmem>>, vector<1x8x32xbf16>
      %134 = vector.shape_cast %133 : vector<1x8x32xbf16> to vector<8x32xbf16>
      %135 = vector.shape_cast %130 : vector<8x32xbf16> to vector<1x8x32xbf16>
      tpu.vector_store %arg14[%c0_75, %c0_76, %c0_77], %135 {strides = array<i32>} : memref<1x8x32xbf16, #tpu.memory_space<vmem>>, vector<1x8x32xbf16>,
      %c0_78 = arith.constant 0 : index
      %c0_79 = arith.constant 0 : index
      %c0_80 = arith.constant 0 : index
      %136 = vector.load %arg15[%c0_78, %c0_79, %c0_80] : memref<1x8x32xbf16, #tpu.memory_space<vmem>>, vector<1x8x32xbf16>
      %137 = vector.shape_cast %136 : vector<1x8x32xbf16> to vector<8x32xbf16>
      %138 = vector.shape_cast %132 : vector<8x32xbf16> to vector<1x8x32xbf16>
      tpu.vector_store %arg15[%c0_78, %c0_79, %c0_80], %138 {strides = array<i32>} : memref<1x8x32xbf16, #tpu.memory_space<vmem>>, vector<1x8x32xbf16>,
      %c0_81 = arith.constant 0 : index
      %c0_82 = arith.constant 0 : index
      %139 = vector.load %arg17[%c0_81, %c0_82] : memref<8x32xbf16, #tpu.memory_space<vmem>>, vector<8x32xbf16>
      tpu.vector_store %arg17[%c0_81, %c0_82], %132 {strides = array<i32>} : memref<8x32xbf16, #tpu.memory_space<vmem>>, vector<8x32xbf16>,
      %140 = tpu.transpose %130, [1, 0] : vector<8x32xbf16> -> vector<32x8xbf16>
      %c0_83 = arith.constant 0 : index
      %c0_84 = arith.constant 0 : index
      %141 = vector.load %arg16[%c0_83, %c0_84] : memref<32x8xbf16, #tpu.memory_space<vmem>>, vector<32x8xbf16>
      tpu.vector_store %arg16[%c0_83, %c0_84], %140 {strides = array<i32>} : memref<32x8xbf16, #tpu.memory_space<vmem>>, vector<32x8xbf16>,
    } else {
    }
    %c0_7 = arith.constant 0 : index
    %c0_8 = arith.constant 0 : index
    %8 = vector.load %arg5[%c0_7, %c0_8] : memref<32x32xbf16, #tpu.memory_space<vmem>>, vector<32x32xbf16>
    %cst = arith.constant dense<0.000000e+00> : vector<8x32xf32>
    %9 = tpu.matmul %1, %8, %cst {dimension_numbers = #tpu.dot_dimension_numbers<[1], [0], [0], [1], [0, 0, 1, 1], [], []>} : vector<8x32xbf16>, vector<32x32xbf16>, vector<8x32xf32> -> vector<8x32xf32>
    %c0_9 = arith.constant 0 : index
    %c0_10 = arith.constant 0 : index
    %10 = vector.load %arg6[%c0_9, %c0_10] : memref<1x32xf32, #tpu.memory_space<vmem>>, vector<1x32xf32>
    %11 = vector.broadcast %10 : vector<1x32xf32> to vector<8x32xf32>
    %12 = arith.addf %9, %11 : vector<8x32xf32>
    %13 = arith.truncf %12 : vector<8x32xf32> to vector<8x32xbf16>
    %14 = vector.extract_strided_slice %13 {offsets = [0, 0], sizes = [8, 8], strides = [1, 1]} : vector<8x32xbf16> to vector<8x8xbf16>
    %c0_11 = arith.constant 0 : index
    %c0_12 = arith.constant 0 : index
    %15 = vector.load %arg16[%c0_11, %c0_12] : memref<32x8xbf16, #tpu.memory_space<vmem>>, vector<8x8xbf16>
    %c0_13 = arith.constant 0 : index
    %c0_14 = arith.constant 0 : index
    %16 = vector.load %arg17[%c0_13, %c0_14] : memref<8x32xbf16, #tpu.memory_space<vmem>>, vector<8x8xbf16>
    %cst_15 = arith.constant dense<0.000000e+00> : vector<8x8xf32>
    %17 = tpu.matmul %14, %15, %cst_15 {dimension_numbers = #tpu.dot_dimension_numbers<[1], [0], [0], [1], [0, 0, 1, 1], [], []>} : vector<8x8xbf16>, vector<8x8xbf16>, vector<8x8xf32> -> vector<8x8xf32>
    %18 = arith.addf %17, %4 : vector<8x8xf32>
    %cst_16 = arith.constant dense<0xFF800000> : vector<8xf32>
    %19 = vector.multi_reduction <maximumf>, %18, %cst_16 [1] : vector<8x8xf32> to vector<8xf32>
    %20 = vector.shape_cast %19 : vector<8xf32> to vector<8x1xf32>
    %21 = vector.broadcast %20 : vector<8x1xf32> to vector<8x8xf32>
    %22 = arith.subf %18, %21 : vector<8x8xf32>
    %23 = math.exp %22 : vector<8x8xf32>
    %cst_17 = arith.constant dense<0.000000e+00> : vector<8xf32>
    %24 = vector.multi_reduction <add>, %23, %cst_17 [1] : vector<8x8xf32> to vector<8xf32>
    %25 = vector.shape_cast %24 : vector<8xf32> to vector<8x1xf32>
    %26 = arith.truncf %23 : vector<8x8xf32> to vector<8x8xbf16>
    %cst_18 = arith.constant dense<0.000000e+00> : vector<8x8xf32>
    %27 = tpu.matmul %26, %16, %cst_18 {dimension_numbers = #tpu.dot_dimension_numbers<[1], [0], [0], [1], [0, 0, 1, 1], [], []>} : vector<8x8xbf16>, vector<8x8xbf16>, vector<8x8xf32> -> vector<8x8xf32>
    %28 = tpu.reciprocal %25 {approx = true} : vector<8x1xf32> -> vector<8x1xf32>
    %29 = vector.broadcast %28 : vector<8x1xf32> to vector<8x8xf32>
    %30 = arith.mulf %27, %29 : vector<8x8xf32>
    %c0_19 = arith.constant 0 : index
    %c0_20 = arith.constant 0 : index
    %31 = vector.load %arg18[%c0_19, %c0_20] : memref<8x32xf32, #tpu.memory_space<vmem>>, vector<8x8xf32>
    tpu.vector_store %arg18[%c0_19, %c0_20], %30 {strides = array<i32>} : memref<8x32xf32, #tpu.memory_space<vmem>>, vector<8x8xf32>,
    %32 = vector.extract_strided_slice %13 {offsets = [0, 8], sizes = [8, 8], strides = [1, 1]} : vector<8x32xbf16> to vector<8x8xbf16>
    %c8 = arith.constant 8 : index
    %c0_21 = arith.constant 0 : index
    %33 = vector.load %arg16[%c8, %c0_21] : memref<32x8xbf16, #tpu.memory_space<vmem>>, vector<8x8xbf16>
    %c0_22 = arith.constant 0 : index
    %c8_23 = arith.constant 8 : index
    %34 = vector.load %arg17[%c0_22, %c8_23] : memref<8x32xbf16, #tpu.memory_space<vmem>>, vector<8x8xbf16>
    %cst_24 = arith.constant dense<0.000000e+00> : vector<8x8xf32>
    %35 = tpu.matmul %32, %33, %cst_24 {dimension_numbers = #tpu.dot_dimension_numbers<[1], [0], [0], [1], [0, 0, 1, 1], [], []>} : vector<8x8xbf16>, vector<8x8xbf16>, vector<8x8xf32> -> vector<8x8xf32>
    %36 = arith.addf %35, %4 : vector<8x8xf32>
    %cst_25 = arith.constant dense<0xFF800000> : vector<8xf32>
    %37 = vector.multi_reduction <maximumf>, %36, %cst_25 [1] : vector<8x8xf32> to vector<8xf32>
    %38 = vector.shape_cast %37 : vector<8xf32> to vector<8x1xf32>
    %39 = vector.broadcast %38 : vector<8x1xf32> to vector<8x8xf32>
    %40 = arith.subf %36, %39 : vector<8x8xf32>
    %41 = math.exp %40 : vector<8x8xf32>
    %cst_26 = arith.constant dense<0.000000e+00> : vector<8xf32>
    %42 = vector.multi_reduction <add>, %41, %cst_26 [1] : vector<8x8xf32> to vector<8xf32>
    %43 = vector.shape_cast %42 : vector<8xf32> to vector<8x1xf32>
    %44 = arith.truncf %41 : vector<8x8xf32> to vector<8x8xbf16>
    %cst_27 = arith.constant dense<0.000000e+00> : vector<8x8xf32>
    %45 = tpu.matmul %44, %34, %cst_27 {dimension_numbers = #tpu.dot_dimension_numbers<[1], [0], [0], [1], [0, 0, 1, 1], [], []>} : vector<8x8xbf16>, vector<8x8xbf16>, vector<8x8xf32> -> vector<8x8xf32>
    %46 = tpu.reciprocal %43 {approx = true} : vector<8x1xf32> -> vector<8x1xf32>
    %47 = vector.broadcast %46 : vector<8x1xf32> to vector<8x8xf32>
    %48 = arith.mulf %45, %47 : vector<8x8xf32>
    %c0_28 = arith.constant 0 : index
    %c8_29 = arith.constant 8 : index
    %49 = vector.load %arg18[%c0_28, %c8_29] : memref<8x32xf32, #tpu.memory_space<vmem>>, vector<8x8xf32>
    tpu.vector_store %arg18[%c0_28, %c8_29], %48 {strides = array<i32>} : memref<8x32xf32, #tpu.memory_space<vmem>>, vector<8x8xf32>,
    %50 = vector.extract_strided_slice %13 {offsets = [0, 16], sizes = [8, 8], strides = [1, 1]} : vector<8x32xbf16> to vector<8x8xbf16>
    %c16 = arith.constant 16 : index
    %c0_30 = arith.constant 0 : index
    %51 = vector.load %arg16[%c16, %c0_30] : memref<32x8xbf16, #tpu.memory_space<vmem>>, vector<8x8xbf16>
    %c0_31 = arith.constant 0 : index
    %c16_32 = arith.constant 16 : index
    %52 = vector.load %arg17[%c0_31, %c16_32] : memref<8x32xbf16, #tpu.memory_space<vmem>>, vector<8x8xbf16>
    %cst_33 = arith.constant dense<0.000000e+00> : vector<8x8xf32>
    %53 = tpu.matmul %50, %51, %cst_33 {dimension_numbers = #tpu.dot_dimension_numbers<[1], [0], [0], [1], [0, 0, 1, 1], [], []>} : vector<8x8xbf16>, vector<8x8xbf16>, vector<8x8xf32> -> vector<8x8xf32>
    %54 = arith.addf %53, %4 : vector<8x8xf32>
    %cst_34 = arith.constant dense<0xFF800000> : vector<8xf32>
    %55 = vector.multi_reduction <maximumf>, %54, %cst_34 [1] : vector<8x8xf32> to vector<8xf32>
    %56 = vector.shape_cast %55 : vector<8xf32> to vector<8x1xf32>
    %57 = vector.broadcast %56 : vector<8x1xf32> to vector<8x8xf32>
    %58 = arith.subf %54, %57 : vector<8x8xf32>
    %59 = math.exp %58 : vector<8x8xf32>
    %cst_35 = arith.constant dense<0.000000e+00> : vector<8xf32>
    %60 = vector.multi_reduction <add>, %59, %cst_35 [1] : vector<8x8xf32> to vector<8xf32>
    %61 = vector.shape_cast %60 : vector<8xf32> to vector<8x1xf32>
    %62 = arith.truncf %59 : vector<8x8xf32> to vector<8x8xbf16>
    %cst_36 = arith.constant dense<0.000000e+00> : vector<8x8xf32>
    %63 = tpu.matmul %62, %52, %cst_36 {dimension_numbers = #tpu.dot_dimension_numbers<[1], [0], [0], [1], [0, 0, 1, 1], [], []>} : vector<8x8xbf16>, vector<8x8xbf16>, vector<8x8xf32> -> vector<8x8xf32>
    %64 = tpu.reciprocal %61 {approx = true} : vector<8x1xf32> -> vector<8x1xf32>
    %65 = vector.broadcast %64 : vector<8x1xf32> to vector<8x8xf32>
    %66 = arith.mulf %63, %65 : vector<8x8xf32>
    %c0_37 = arith.constant 0 : index
    %c16_38 = arith.constant 16 : index
    %67 = vector.load %arg18[%c0_37, %c16_38] : memref<8x32xf32, #tpu.memory_space<vmem>>, vector<8x8xf32>
    tpu.vector_store %arg18[%c0_37, %c16_38], %66 {strides = array<i32>} : memref<8x32xf32, #tpu.memory_space<vmem>>, vector<8x8xf32>,
    %68 = vector.extract_strided_slice %13 {offsets = [0, 24], sizes = [8, 8], strides = [1, 1]} : vector<8x32xbf16> to vector<8x8xbf16>
    %c24 = arith.constant 24 : index
    %c0_39 = arith.constant 0 : index
    %69 = vector.load %arg16[%c24, %c0_39] : memref<32x8xbf16, #tpu.memory_space<vmem>>, vector<8x8xbf16>
    %c0_40 = arith.constant 0 : index
    %c24_41 = arith.constant 24 : index
    %70 = vector.load %arg17[%c0_40, %c24_41] : memref<8x32xbf16, #tpu.memory_space<vmem>>, vector<8x8xbf16>
    %cst_42 = arith.constant dense<0.000000e+00> : vector<8x8xf32>
    %71 = tpu.matmul %68, %69, %cst_42 {dimension_numbers = #tpu.dot_dimension_numbers<[1], [0], [0], [1], [0, 0, 1, 1], [], []>} : vector<8x8xbf16>, vector<8x8xbf16>, vector<8x8xf32> -> vector<8x8xf32>
    %72 = arith.addf %71, %4 : vector<8x8xf32>
    %cst_43 = arith.constant dense<0xFF800000> : vector<8xf32>
    %73 = vector.multi_reduction <maximumf>, %72, %cst_43 [1] : vector<8x8xf32> to vector<8xf32>
    %74 = vector.shape_cast %73 : vector<8xf32> to vector<8x1xf32>
    %75 = vector.broadcast %74 : vector<8x1xf32> to vector<8x8xf32>
    %76 = arith.subf %72, %75 : vector<8x8xf32>
    %77 = math.exp %76 : vector<8x8xf32>
    %cst_44 = arith.constant dense<0.000000e+00> : vector<8xf32>
    %78 = vector.multi_reduction <add>, %77, %cst_44 [1] : vector<8x8xf32> to vector<8xf32>
    %79 = vector.shape_cast %78 : vector<8xf32> to vector<8x1xf32>
    %80 = arith.truncf %77 : vector<8x8xf32> to vector<8x8xbf16>
    %cst_45 = arith.constant dense<0.000000e+00> : vector<8x8xf32>
    %81 = tpu.matmul %80, %70, %cst_45 {dimension_numbers = #tpu.dot_dimension_numbers<[1], [0], [0], [1], [0, 0, 1, 1], [], []>} : vector<8x8xbf16>, vector<8x8xbf16>, vector<8x8xf32> -> vector<8x8xf32>
    %82 = tpu.reciprocal %79 {approx = true} : vector<8x1xf32> -> vector<8x1xf32>
    %83 = vector.broadcast %82 : vector<8x1xf32> to vector<8x8xf32>
    %84 = arith.mulf %81, %83 : vector<8x8xf32>
    %c0_46 = arith.constant 0 : index
    %c24_47 = arith.constant 24 : index
    %85 = vector.load %arg18[%c0_46, %c24_47] : memref<8x32xf32, #tpu.memory_space<vmem>>, vector<8x8xf32>
    tpu.vector_store %arg18[%c0_46, %c24_47], %84 {strides = array<i32>} : memref<8x32xf32, #tpu.memory_space<vmem>>, vector<8x8xf32>,
    %c0_48 = arith.constant 0 : index
    %c0_49 = arith.constant 0 : index
    %86 = vector.load %arg18[%c0_48, %c0_49] : memref<8x32xf32, #tpu.memory_space<vmem>>, vector<8x32xf32>
    %87 = arith.truncf %86 : vector<8x32xf32> to vector<8x32xbf16>
    %c0_50 = arith.constant 0 : index
    %c0_51 = arith.constant 0 : index
    %88 = vector.load %arg9[%c0_50, %c0_51] : memref<32x32xbf16, #tpu.memory_space<vmem>>, vector<32x32xbf16>
    %cst_52 = arith.constant dense<0.000000e+00> : vector<8x32xf32>
    %89 = tpu.matmul %87, %88, %cst_52 {dimension_numbers = #tpu.dot_dimension_numbers<[1], [0], [0], [1], [0, 0, 1, 1], [], []>} : vector<8x32xbf16>, vector<32x32xbf16>, vector<8x32xf32> -> vector<8x32xf32>
    %c0_53 = arith.constant 0 : index
    %c0_54 = arith.constant 0 : index
    %90 = vector.load %arg10[%c0_53, %c0_54] : memref<1x32xf32, #tpu.memory_space<vmem>>, vector<1x32xf32>
    %91 = vector.broadcast %90 : vector<1x32xf32> to vector<8x32xf32>
    %92 = arith.addf %89, %91 : vector<8x32xf32>
    %93 = arith.addf %2, %92 : vector<8x32xf32>
    %cst_55 = arith.constant dense<0.000000e+00> : vector<8xf32>
    %94 = vector.multi_reduction <add>, %93, %cst_55 [1] : vector<8x32xf32> to vector<8xf32>
    %95 = vector.shape_cast %94 : vector<8xf32> to vector<8x1xf32>
    %cst_56 = arith.constant 3.200000e+01 : f32
    %96 = vector.broadcast %cst_56 : f32 to vector<8x1xf32>
    %97 = arith.divf %95, %96 : vector<8x1xf32>
    %98 = vector.broadcast %97 : vector<8x1xf32> to vector<8x32xf32>
    %99 = arith.subf %93, %98 : vector<8x32xf32>
    %100 = arith.mulf %99, %99 : vector<8x32xf32>
    %cst_57 = arith.constant dense<0.000000e+00> : vector<8xf32>
    %101 = vector.multi_reduction <add>, %100, %cst_57 [1] : vector<8x32xf32> to vector<8xf32>
    %102 = vector.shape_cast %101 : vector<8xf32> to vector<8x1xf32>
    %cst_58 = arith.constant 3.200000e+01 : f32
    %103 = vector.broadcast %cst_58 : f32 to vector<8x1xf32>
    %104 = arith.divf %102, %103 : vector<8x1xf32>
    %105 = vector.broadcast %97 : vector<8x1xf32> to vector<8x32xf32>
    %106 = arith.subf %93, %105 : vector<8x32xf32>
    %cst_59 = arith.constant 9.99999974E-6 : f32
    %107 = vector.broadcast %cst_59 : f32 to vector<8x1xf32>
    %108 = arith.addf %104, %107 : vector<8x1xf32>
    %109 = math.rsqrt %108 : vector<8x1xf32>
    %110 = vector.broadcast %109 : vector<8x1xf32> to vector<8x32xf32>
    %111 = arith.mulf %106, %110 : vector<8x32xf32>
    %c0_60 = arith.constant 0 : index
    %c0_61 = arith.constant 0 : index
    %112 = vector.load %arg11[%c0_60, %c0_61] : memref<1x32xf32, #tpu.memory_space<vmem>>, vector<1x32xf32>
    %113 = vector.broadcast %112 : vector<1x32xf32> to vector<8x32xf32>
    %114 = arith.mulf %111, %113 : vector<8x32xf32>
    %c0_62 = arith.constant 0 : index
    %c0_63 = arith.constant 0 : index
    %115 = vector.load %arg12[%c0_62, %c0_63] : memref<1x32xf32, #tpu.memory_space<vmem>>, vector<1x32xf32>
    %116 = vector.broadcast %115 : vector<1x32xf32> to vector<8x32xf32>
    %117 = arith.addf %114, %116 : vector<8x32xf32>
    %118 = arith.truncf %117 : vector<8x32xf32> to vector<8x32xbf16>
    %c0_64 = arith.constant 0 : index
    %c0_65 = arith.constant 0 : index
    %c0_66 = arith.constant 0 : index
    %119 = vector.load %arg13[%c0_64, %c0_65, %c0_66] : memref<1x8x32xbf16, #tpu.memory_space<vmem>>, vector<1x8x32xbf16>
    %120 = vector.shape_cast %119 : vector<1x8x32xbf16> to vector<8x32xbf16>
    %121 = vector.shape_cast %118 : vector<8x32xbf16> to vector<1x8x32xbf16>
    tpu.vector_store %arg13[%c0_64, %c0_65, %c0_66], %121 {strides = array<i32>} : memref<1x8x32xbf16, #tpu.memory_space<vmem>>, vector<1x8x32xbf16>,
    return
  }
  func.func @transform_0(%arg0: i32, %arg1: i32) -> (i32, i32, i32) {
    %c0_i32 = arith.constant 0 : i32
    %c0_i32_0 = arith.constant 0 : i32
    return %arg0, %arg1, %c0_i32 : i32, i32, i32
  }
  func.func @transform_1(%arg0: i32, %arg1: i32) -> (i32, i32, i32) {
    %c0_i32 = arith.constant 0 : i32
    %c0_i32_0 = arith.constant 0 : i32
    %c0_i32_1 = arith.constant 0 : i32
    return %arg0, %c0_i32, %c0_i32_0 : i32, i32, i32
  }
  func.func @transform_2(%arg0: i32, %arg1: i32) -> (i32, i32, i32, i32) {
    %c0_i32 = arith.constant 0 : i32
    %c0_i32_0 = arith.constant 0 : i32
    %c0_i32_1 = arith.constant 0 : i32
    return %arg0, %c0_i32, %arg1, %c0_i32_0 : i32, i32, i32, i32
  }
  func.func @transform_3(%arg0: i32, %arg1: i32) -> (i32, i32) {
    %c0_i32 = arith.constant 0 : i32
    %c0_i32_0 = arith.constant 0 : i32
    %c0_i32_1 = arith.constant 0 : i32
    return %c0_i32, %c0_i32_0 : i32, i32
  }
  func.func @transform_4(%arg0: i32, %arg1: i32) -> (i32, i32) {
    %c0_i32 = arith.constant 0 : i32
    %c0_i32_0 = arith.constant 0 : i32
    %c0_i32_1 = arith.constant 0 : i32
    return %c0_i32, %c0_i32_0 : i32, i32
  }
  func.func @transform_5(%arg0: i32, %arg1: i32) -> (i32, i32) {
    %c0_i32 = arith.constant 0 : i32
    %c0_i32_0 = arith.constant 0 : i32
    %c0_i32_1 = arith.constant 0 : i32
    return %c0_i32, %c0_i32_0 : i32, i32
  }
  func.func @transform_6(%arg0: i32, %arg1: i32) -> (i32, i32) {
    %c0_i32 = arith.constant 0 : i32
    %c0_i32_0 = arith.constant 0 : i32
    %c0_i32_1 = arith.constant 0 : i32
    return %c0_i32, %c0_i32_0 : i32, i32
  }
  func.func @transform_7(%arg0: i32, %arg1: i32) -> (i32, i32) {
    %c0_i32 = arith.constant 0 : i32
    %c0_i32_0 = arith.constant 0 : i32
    %c0_i32_1 = arith.constant 0 : i32
    return %c0_i32, %c0_i32_0 : i32, i32
  }
  func.func @transform_8(%arg0: i32, %arg1: i32) -> (i32, i32) {
    %c0_i32 = arith.constant 0 : i32
    %c0_i32_0 = arith.constant 0 : i32
    %c0_i32_1 = arith.constant 0 : i32
    return %c0_i32, %c0_i32_0 : i32, i32
  }
  func.func @transform_9(%arg0: i32, %arg1: i32) -> (i32, i32) {
    %c0_i32 = arith.constant 0 : i32
    %c0_i32_0 = arith.constant 0 : i32
    %c0_i32_1 = arith.constant 0 : i32
    return %c0_i32, %c0_i32_0 : i32, i32
  }
  func.func @transform_10(%arg0: i32, %arg1: i32) -> (i32, i32) {
    %c0_i32 = arith.constant 0 : i32
    %c0_i32_0 = arith.constant 0 : i32
    %c0_i32_1 = arith.constant 0 : i32
    return %c0_i32, %c0_i32_0 : i32, i32
  }
  func.func @transform_11(%arg0: i32, %arg1: i32) -> (i32, i32, i32) {
    %c0_i32 = arith.constant 0 : i32
    %c0_i32_0 = arith.constant 0 : i32
    return %arg0, %arg1, %c0_i32 : i32, i32, i32
  }
  func.func @transform_12(%arg0: i32, %arg1: i32) -> (i32, i32, i32) {
    %c0_i32 = arith.constant 0 : i32
    %c0_i32_0 = arith.constant 0 : i32
    %c0_i32_1 = arith.constant 0 : i32
    return %arg0, %c0_i32, %c0_i32_0 : i32, i32, i32
  }
  func.func @transform_13(%arg0: i32, %arg1: i32) -> (i32, i32, i32) {
    %c0_i32 = arith.constant 0 : i32
    %c0_i32_0 = arith.constant 0 : i32
    %c0_i32_1 = arith.constant 0 : i32
    return %arg0, %c0_i32, %c0_i32_0 : i32, i32, i32
  }
}

</mosaic_0001>

<bundles_post_ra>
// kernel: tpu_custom_call.1
= control target key start
LH: loop header
LB: loop body
LE: loop exit
PB: predicated region body
PF: predicated region fallthrough
CT: control target
= control target key end

     0   :  { %s3237_s0 = inlined_call_operand.hbm [shape: bf16[2,8,32], index: 0, kind: input, shape index: {}]   ;;  %s3238_s1 = inlined_call_operand.hbm [shape: bf16[2,8,32], index: 1, kind: input, shape index: {}]   ;;  %s3239_s2 = inlined_call_operand.hbm [shape: f32[2,1,8,8], index: 2, kind: input, shape index: {}]   ;;  %s3240_s3 = inlined_call_operand.hbm [shape: bf16[32,32], index: 3, kind: input, shape index: {}]   ;;  %s3241_s4 = inlined_call_operand.hbm [shape: f32[1,32], index: 4, kind: input, shape index: {}]   ;;  %s3242_s5 = inlined_call_operand.hbm [shape: bf16[32,64], index: 5, kind: input, shape index: {}]   ;;  %s3243_s6 = inlined_call_operand.hbm [shape: f32[1,64], index: 6, kind: input, shape index: {}]   ;;  %s3244_s7 = inlined_call_operand.hbm [shape: bf16[32,32], index: 7, kind: input, shape index: {}]   ;;  %s3245_s8 = inlined_call_operand.hbm [shape: f32[1,32], index: 8, kind: input, shape index: {}]   ;;  %s3246_s9 = inlined_call_operand.hbm [shape: f32[1,32], index: 9, kind: input, shape index: {}]   ;;  %s3247_s10 = inlined_call_operand.hbm [shape: f32[1,32], index: 10, kind: input, shape index: {}]   ;;  %s3248_s11 = inlined_call_operand.hbm [shape: bf16[2,8,32], index: 11, kind: output, shape index: {0}]   ;;  %s3249_s12 = inlined_call_operand.hbm [shape: bf16[2,8,32], index: 12, kind: output, shape index: {1}]   ;;  %s3250_s13 = inlined_call_operand.hbm [shape: bf16[2,8,32], index: 13, kind: output, shape index: {2}]  }
   0x1   :  { %3277 = sst [smem:[#allocation46_spill]] %s3237_s0 }
   0x2   :  { %3278 = sst [smem:[#allocation47_spill]] %s3238_s1 }
   0x3   :  { %3279 = sst [smem:[#allocation48_spill]] %s3241_s4 }
   0x4   :  { %3280 = sst [smem:[#allocation49_spill]] %s3243_s6 }
   0x5   :  { %3281 = sst [smem:[#allocation50_spill]] %s3245_s8 }
   0x6   :  { %3282 = sst [smem:[#allocation51_spill]] %s3248_s11 }
   0x7   :  { %3283 = sst [smem:[#allocation52_spill]] %s3249_s12 }
   0x8   :  { %3284 = sst [smem:[#allocation53_spill]] %s3250_s13 }
   0x9   :  { %19 = vsyncpa [#allocation6], 0 }
   0xa   :  { %21 = vsyncpa [#allocation6 + $0x1], 0 }
   0xb   :  { %22 = vsyncpa [#allocation9], 0 }
   0xc   :  { %23 = vsyncpa [#allocation13], 0 }
   0xd   :  { %24 = vsyncpa [#allocation16], 0 }
   0xe   :  { %25 = vsyncpa [#allocation19], 0 }
   0xf   :  { %26 = vsyncpa [#allocation22], 0 }
  0x10   :  { %27 = vsyncpa [#allocation7], 0 }
  0x11   :  { %29 = vsyncpa [#allocation7 + $0x1], 0 }
  0x12   :  { %30 = vsyncpa [#allocation25], 0 }
  0x13   :  { %32 = vsyncpa [#allocation25 + $0x1], 0  ;;  %s2649_s25 = smov 0   ;;  %s2651_s26 = smov 0  }
  0x14   :  { %s2653_s27 = smov 0   ;;  %s2655_s28 = smov 0  }
  0x15   :  { %s2657_s29 = smov 0   ;;  %s2659_s30 = smov 0  }
  0x16 LB: > { %3285 = sst [smem:[#allocation37_spill]] %s2532_s25  ;;  %s2678_s14 = sadd.s32 4294967295, %s2552_s30   ;;  %s2552_s30 = sphi %s2659_s30, %s38_s30   ;;  %s2548_s29 = sphi %s2657_s29, %s3346_s29   ;;  %s2544_s28 = sphi %s2655_s28, %s3345_s28   ;;  %s2540_s27 = sphi %s2653_s27, %s3341_s27   ;;  %s2536_s26 = sphi %s2651_s26, %s3344_s26   ;;  %s2532_s25 = sphi %s2649_s25, %s3343_s25  }
  0x17   : > { %3286 = sst [smem:[#allocation38_spill]] %s2540_s27  ;;  %s3251_s15 = sadd.s32 4294967294, %s2552_s30  }
  0x18   : > { %3287 = sst [smem:[#allocation39_spill]] %s2552_s30  ;;  %p72_p0 = scmp.ne.s32.totalorder %s2536_s26, %s2532_s25 }
  0x19   : > { %p3257_p1 = scmp.eq.s32.totalorder %s2678_s14, 0  ;;  %p326_p3 = scmp.eq.s32.totalorder %s3251_s15, 1 }
  0x1a   : > { %p1704_p5 = scmp.ge.s32.totalorder %s2552_s30, 1  ;;  %p385_p7 = scmp.lt.s32.totalorder %s2552_s30, 3 }
  0x1b   : > { %p2689_p4 = por %p3257_p1, %p72_p0  ;;  %p2694_p6 = por %p326_p3, %p72_p0 }
  0x1c   : > { %s2699_s18 = sshll.u32 %s2544_s28, 6  ;;  %p2701_p8 = pnand %p1704_p5, %p385_p7 }
  0x1d   : > { %s3288_s16 = scalar_select %p2689_p4, 1, 0 }
  0x1e   : > { %s3290_s17 = scalar_select %p2694_p6, 1, 0 }
  0x1f   : > { %3289 = sst [smem:[#allocation40_spill]] %s3288_s16  ;;  %s3294_s1 = sld [smem:[#allocation47_spill]] }
  0x20   : > { %3291 = sst [smem:[#allocation41_spill]] %s3290_s17  ;;  %s2554_s23 = smov [#allocation8]  }
  0x21   : > { %3292 = sst [smem:[#allocation42_spill]] %s2699_s18  ;;  %s400_s24 = sshll.u32 %s2554_s23, 4  ;;  %s401_s24 = int_to_ptr.vmem [resolvable:$true] %s400_s24 }
  0x22   : > { %s3293_s19 = scalar_select %p2701_p8, 1, 0 }
  0x23   : > { %p1909_p9 = pneg %p2701_p8  ;;  %s2555_s21 = smov [#allocation12]  }
  0x24   : > { %s424_s15 = sshll.u32 %s2555_s21, 4  ;;  %s425_s15 = int_to_ptr.vmem [resolvable:$true] %s424_s15 }
  0x25   : > { %s2709_s22 = scalar_lea.hbm %s3294_s1, %s2699_s18  ;;  %p2716_p11 = pnand %p1909_p9, %p2689_p4 }
  0x26   : > { %p2722_p12 = pnand %p1909_p9, %p3257_p1  ;;  %s2068_s23 = scalar_lea.hbm %s2709_s22, 64 }
  0x27   : > { %p2069_p13 = scmp.ne.s32.totalorder %s2709_s22, %s2068_s23  ;;  %p2070_p0 = pneg %p2716_p11 }
  0x28   : > { %s3296_s20 = scalar_select %p2722_p12, 1, 0 }
  0x29   : > { %p2071_p3 = pnand %p2070_p0, %p2069_p13  ;;  %s2073_s11 = scalar_lea.hbm %s3294_s1, 128 }
  0x2a   : > { %p2074_p7 = scmp.lt.u32.totalorder %s2709_s22, %s3294_s1  ;;  %p2075_p9 = scmp.lt.u32.totalorder %s2073_s11, %s2068_s23 }
  0x2b   : > { %p2072_p5 = pneg %p2071_p3  ;;  %p2077_p1 = scmp.lt.u32.totalorder %s2068_s23, %s2709_s22 }
  0x2c   : > { %p2076_p10 = por %p2075_p9, %p2074_p7 }
  0x2e   : > { %p2078_p2 = por %p2077_p1, %p2076_p10 }
  0x30   : > { %p2079_p6 = pnand %p2078_p2, %p2072_p5 }
  0x32   : > { %2082 = shalt.err (!%p2079_p6)
}
  0x33   : > { %s2083_s21 = scalar_lea.vmem %s401_s24, 64  ;;  %p2091_p8 = scmp.lt.s32.totalorder %s401_s24, %s401_s24 }
  0x34   : > { %p2084_p4 = scmp.ne.s32.totalorder %s401_s24, %s2083_s21  ;;  %p2092_p12 = scmp.lt.s32.totalorder %s2083_s21, %s2083_s21 }
  0x36   : > { %p2086_p13 = pnand %p2084_p4, %p2070_p0  ;;  %p2093_p7 = por %p2092_p12, %p2091_p8 }
  0x38   : > { %p2087_p3 = pneg %p2086_p13 }
  0x3a   : > { %p2094_p9 = pnand %p2093_p7, %p2087_p3 }
  0x3c   : > { %2097 = shalt.err (!%p2094_p9)
}
  0x3d   : > { %1912 = dma.hbm_to_vmem [thread:$0]  (!%p2716_p11), %s2709_s22, 64, %s401_s24, [#allocation9]  }
  0x3e   : > { %s2556_s11 = smov [#allocation15]   ;;  %s3297_s4 = sld [smem:[#allocation48_spill]] }
  0x3f   : > { %s448_s12 = sshll.u32 %s2556_s11, 4  ;;  %p3298_p2 = scmp.ne.s32.totalorder %s3296_s20, 0  ;;  %s449_s12 = int_to_ptr.vmem [resolvable:$true] %s448_s12 }
  0x41   : > { %p2755_p4 = pneg %p3298_p2 }
  0x44   : > { %s2098_s17 = scalar_lea.hbm %s3297_s4, 16 }
  0x45   : > { %p2099_p1 = scmp.ne.s32.totalorder %s3297_s4, %s2098_s17  ;;  %p2105_p10 = scmp.lt.u32.totalorder %s2098_s17, %s3297_s4 }
  0x47   : > { %p2101_p6 = pnand %p2755_p4, %p2099_p1 }
  0x49   : > { %p2102_p8 = pneg %p2101_p6 }
  0x4b   : > { %p2107_p11 = pnand %p2105_p10, %p2102_p8 }
  0x4d   : > { %2110 = shalt.err (!%p2107_p11)
}
  0x4e   : > { %s2111_s28 = scalar_lea.vmem %s425_s15, 16  ;;  %s2118_s1 = scalar_lea.vmem %s425_s15, 32 }
  0x4f   : > { %p2112_p12 = scmp.ne.s32.totalorder %s425_s15, %s2111_s28  ;;  %p2119_p13 = scmp.lt.s32.totalorder %s425_s15, %s425_s15 }
  0x50   : > { %p2120_p3 = scmp.lt.s32.totalorder %s2118_s1, %s2111_s28 }
  0x51   : > { %p2114_p0 = pnand %p2112_p12, %p2755_p4 }
  0x52   : > { %p2121_p7 = por %p2120_p3, %p2119_p13 }
  0x53   : > { %p2115_p5 = pneg %p2114_p0 }
  0x55   : > { %p2122_p9 = pnand %p2121_p7, %p2115_p5 }
  0x57   : > { %2125 = shalt.err (!%p2122_p9)
}
  0x58   : > { %1918 = dma.hbm_to_vmem [thread:$0]  (!%p3298_p2), %s3297_s4, 16, %s425_s15, [#allocation13]  }
  0x59   : > { %s3300_s6 = sld [smem:[#allocation49_spill]] }
  0x5f   : > { %s2126_s23 = scalar_lea.hbm %s3300_s6, 16 }
  0x60   : > { %p2127_p1 = scmp.ne.s32.totalorder %s3300_s6, %s2126_s23  ;;  %p2133_p10 = scmp.lt.u32.totalorder %s2126_s23, %s3300_s6 }
  0x62   : > { %p2129_p6 = pnand %p2127_p1, %p2755_p4 }
  0x64   : > { %p2130_p8 = pneg %p2129_p6 }
  0x66   : > { %p2135_p11 = pnand %p2133_p10, %p2130_p8 }
  0x68   : > { %2138 = shalt.err (!%p2135_p11)
}
  0x69   : > { %s2139_s11 = scalar_lea.vmem %s449_s12, 16  ;;  %s2146_s15 = scalar_lea.vmem %s449_s12, 32 }
  0x6a   : > { %p2140_p12 = scmp.ne.s32.totalorder %s449_s12, %s2139_s11  ;;  %p2147_p13 = scmp.lt.s32.totalorder %s449_s12, %s449_s12 }
  0x6b   : > { %p2148_p3 = scmp.lt.s32.totalorder %s2146_s15, %s2139_s11 }
  0x6c   : > { %p2142_p0 = pnand %p2140_p12, %p2755_p4 }
  0x6d   : > { %p2149_p7 = por %p2148_p3, %p2147_p13 }
  0x6e   : > { %p2143_p5 = pneg %p2142_p0 }
  0x70   : > { %p2150_p9 = pnand %p2149_p7, %p2143_p5 }
  0x72   : > { %2153 = shalt.err (!%p2150_p9)
}
  0x73   : > { %1924 = dma.hbm_to_vmem [thread:$0]  (!%p3298_p2), %s3300_s6, 16, %s449_s12, [#allocation16]  }
  0x74   : > { %s2557_s17 = smov [#allocation18]   ;;  %s3301_s8 = sld [smem:[#allocation50_spill]] }
  0x75   : > { %s472_s23 = sshll.u32 %s2557_s17, 4  ;;  %s473_s23 = int_to_ptr.vmem [resolvable:$true] %s472_s23 }
  0x7a   : > { %s2154_s28 = scalar_lea.hbm %s3301_s8, 16 }
  0x7b   : > { %p2155_p1 = scmp.ne.s32.totalorder %s3301_s8, %s2154_s28  ;;  %p2161_p10 = scmp.lt.u32.totalorder %s2154_s28, %s3301_s8 }
  0x7d   : > { %p2157_p6 = pnand %p2155_p1, %p2755_p4 }
  0x7f   : > { %p2158_p8 = pneg %p2157_p6 }
  0x81   : > { %p2163_p11 = pnand %p2161_p10, %p2158_p8 }
  0x83   : > { %2166 = shalt.err (!%p2163_p11)
}
  0x84   : > { %s2167_s12 = scalar_lea.vmem %s473_s23, 16  ;;  %s2174_s13 = scalar_lea.vmem %s473_s23, 32 }
  0x85   : > { %p2168_p12 = scmp.ne.s32.totalorder %s473_s23, %s2167_s12  ;;  %p2175_p13 = scmp.lt.s32.totalorder %s473_s23, %s473_s23 }
  0x86   : > { %p2176_p3 = scmp.lt.s32.totalorder %s2174_s13, %s2167_s12 }
  0x87   : > { %p2170_p0 = pnand %p2168_p12, %p2755_p4 }
  0x88   : > { %p2177_p7 = por %p2176_p3, %p2175_p13 }
  0x89   : > { %p2171_p5 = pneg %p2170_p0 }
  0x8b   : > { %p2178_p9 = pnand %p2177_p7, %p2171_p5 }
  0x8d   : > { %2181 = shalt.err (!%p2178_p9)
}
  0x8e   : > { %1930 = dma.hbm_to_vmem [thread:$0]  (!%p3298_p2), %s3301_s8, 16, %s473_s23, [#allocation19]  }
  0x8f   : > { %s50_s17 = sadd.s32 1, %s2548_s29  ;;  %s59_s22 = sadd.s32 1, %s2540_s27 }
  0x90   : > { %p52_p1 = scmp.ge.s32.totalorder %s50_s17, 2  ;;  %p66_p6 = scmp.ne.s32.totalorder %s2540_s27, %s2536_s26 }
  0x91   : > { %p67_p8 = scmp.eq.s32.totalorder %s2552_s30, 0  ;;  %p1962_p10 = scmp.lt.s32.totalorder %s2552_s30, 2 }
  0x92   : > { %s3348_s17 = smov (%p52_p1, %s50_s17), 0  ;;  %p3303_p12 = scmp.eq.s32.totalorder %s2678_s14, 1 }
  0x93   : > { %3302 = sst [smem:[#allocation43_spill]] %s3348_s17  ;;  %p68_p11 = por %p67_p8, %p66_p6 }
  0x94   : > { %p2817_p0 = por %p3303_p12, %p66_p6  ;;  %s54_s28 = ssub.s32 %s2548_s29, %s3348_s17 }
  0x95   : > { %s505_s1 = sand.u32 1, %s2552_s30   ;;  %p57_p5 = scmp.eq.s32.totalorder %s54_s28, 0 }
  0x96   : > { %s3304_s24 = scalar_select %p2817_p0, 1, 0 }
  0x97   : > { %s507_s11 = sand.u32 1, %s2540_s27   ;;  %s1716_s23 = sshll.u32 %s2548_s29, 6 }
  0x98   : > { %3305 = sst [smem:[#allocation44_spill]] %s3304_s24  ;;  %s1715_s12 = sshll.u32 %s507_s11, 2 }
  0x99   : > { %s2827_s15 = scalar_select %p57_p5, %s2540_s27, %s59_s22  }
  0x9a   : > { %s3307_s0 = sld [smem:[#allocation46_spill]]  ;;  %p2834_p13 = pnand %p1962_p10, %p68_p11 }
  0x9b   : > { %3306 = sst [smem:[#allocation45_spill]] %s2827_s15  ;;  %s509_s28 = scalar_lea.vmem [#allocation5], %s1715_s12 }
  0x9c   : > { %s3308_s6 = scalar_select %p2834_p13, 1, 0 }
  0x9d   : > { %s517_s8 = sshll.u32 %s509_s28, 4  ;;  %s2838_s22 = sshll.u32 %s507_s11, 3  ;;  %s2840_s8 = int_to_ptr.vmem [resolvable:$true] %s517_s8 }
  0x9e   : > { %s2842_s17 = scalar_lea.sflag [#allocation6], %s505_s1  ;;  %p3265_p7 = pneg %p2834_p13 }
  0xa0   : > { %s2832_s25 = scalar_lea.hbm %s3307_s0, %s1716_s23  ;;  %s2187_s15 = scalar_lea.hbm %s3307_s0, 128 }
  0xa1   : > { %s2182_s23 = scalar_lea.hbm %s2832_s25, 64  ;;  %p2188_p6 = scmp.lt.u32.totalorder %s2832_s25, %s3307_s0 }
  0xa2   : > { %p2183_p3 = scmp.ne.s32.totalorder %s2832_s25, %s2182_s23  ;;  %p2189_p8 = scmp.lt.u32.totalorder %s2187_s15, %s2182_s23 }
  0xa3   : > { %p2191_p11 = scmp.lt.u32.totalorder %s2182_s23, %s2832_s25 }
  0xa4   : > { %p2185_p9 = pnand %p3265_p7, %p2183_p3  ;;  %p2190_p10 = por %p2189_p8, %p2188_p6 }
  0xa6   : > { %p2186_p1 = pneg %p2185_p9  ;;  %p2192_p12 = por %p2191_p11, %p2190_p10 }
  0xa8   : > { %p2193_p5 = pnand %p2192_p12, %p2186_p1 }
  0xaa   : > { %2196 = shalt.err (!%p2193_p5)
}
  0xab   : > { %s2197_s1 = scalar_lea.vmem %s2840_s8, 64  ;;  %s2558_s11 = smov [#allocation5]  }
  0xac   : > { %p2198_p3 = scmp.ne.s32.totalorder %s2840_s8, %s2197_s1  ;;  %s2202_s13 = sshll.u32 %s2558_s11, 4  ;;  %s2203_s13 = int_to_ptr.vmem [resolvable:$false] %s2202_s13 }
  0xad   : > { %s2204_s4 = scalar_lea.vmem %s2203_s13, 128  ;;  %p2205_p2 = scmp.lt.s32.totalorder %s2840_s8, %s2203_s13 }
  0xae   : > { %p2200_p9 = pnand %p2198_p3, %p3265_p7  ;;  %p2206_p6 = scmp.lt.s32.totalorder %s2204_s4, %s2197_s1 }
  0xb0   : > { %p2201_p0 = pneg %p2200_p9  ;;  %p2207_p8 = por %p2206_p6, %p2205_p2 }
  0xb2   : > { %p2208_p10 = pnand %p2207_p8, %p2201_p0 }
  0xb4   : > { %2211 = shalt.err (!%p2208_p10)
}
  0xb5   : > { %1940 = dma.hbm_to_vmem [thread:$0]  (!%p2834_p13), %s2832_s25, 64, %s2840_s8, %s2842_s17  }
  0xb6   : > { %s2559_s15 = smov [#allocation11]   ;;  %s2212_s11 = scalar_lea.hbm %s3240_s3, 256 }
  0xb7   : > { %s410_s23 = sshll.u32 %s2559_s15, 4  ;;  %p2213_p2 = scmp.ne.s32.totalorder %s3240_s3, %s2212_s11  ;;  %s411_s23 = int_to_ptr.vmem [resolvable:$true] %s410_s23 }
  0xb8   : > { %p2219_p11 = scmp.lt.u32.totalorder %s2212_s11, %s3240_s3 }
  0xb9   : > { %p2215_p0 = pnand %p2213_p2, %p2755_p4 }
  0xbb   : > { %p2216_p1 = pneg %p2215_p0 }
  0xbd   : > { %p2221_p12 = pnand %p2219_p11, %p2216_p1 }
  0xbf   : > { %2224 = shalt.err (!%p2221_p12)
}
  0xc0   : > { %s2225_s8 = scalar_lea.vmem %s411_s23, 256  ;;  %p2233_p6 = scmp.lt.s32.totalorder %s411_s23, %s411_s23 }
  0xc1   : > { %p2226_p5 = scmp.ne.s32.totalorder %s411_s23, %s2225_s8  ;;  %p2234_p8 = scmp.lt.s32.totalorder %s2225_s8, %s2225_s8 }
  0xc3   : > { %p2228_p3 = pnand %p2226_p5, %p2755_p4  ;;  %p2235_p10 = por %p2234_p8, %p2233_p6 }
  0xc5   : > { %p2229_p9 = pneg %p2228_p3 }
  0xc7   : > { %p2236_p7 = pnand %p2235_p10, %p2229_p9 }
  0xc9   : > { %2239 = shalt.err (!%p2236_p7)
}
  0xca   : > { %s2560_s0 = smov 64   ;;  %s2561_s25 = smov 4  }
  0xcb   : > { %p3309_p2 = scmp.ne.s32.totalorder %s3296_s20, 0  ;;  %s2562_s28 = smov [#allocation14]  }
  0xcc   : > { %s434_s11 = sshll.u32 %s2562_s28, 4  ;;  %s2563_s13 = smov [#allocation17]   ;;  %s435_s11 = int_to_ptr.vmem [resolvable:$true] %s434_s11 }
  0xcd   : > { %1915 = dma.hbm_to_vmem [thread:$0]  (!%p3309_p2), %s3240_s3, 256, %s411_s23, [#allocation9], %s2560_s0, %s2560_s0, %s2561_s25  }
  0xce   : > { %s458_s1 = sshll.u32 %s2563_s13, 4  ;;  %s2240_s27 = scalar_lea.hbm %s3242_s5, 256  ;;  %s459_s1 = int_to_ptr.vmem [resolvable:$true] %s458_s1 }
  0xcf   : > { %p2241_p7 = scmp.ne.s32.totalorder %s3242_s5, %s2240_s27  ;;  %p2247_p11 = scmp.lt.u32.totalorder %s2240_s27, %s3242_s5 }
  0xd1   : > { %p2243_p0 = pnand %p2241_p7, %p2755_p4 }
  0xd3   : > { %p2244_p1 = pneg %p2243_p0 }
  0xd5   : > { %p2249_p12 = pnand %p2247_p11, %p2244_p1 }
  0xd7   : > { %2252 = shalt.err (!%p2249_p12)
}
  0xd8   : > { %s2253_s23 = scalar_lea.vmem %s435_s11, 256  ;;  %p2261_p6 = scmp.lt.s32.totalorder %s435_s11, %s435_s11 }
  0xd9   : > { %p2254_p5 = scmp.ne.s32.totalorder %s435_s11, %s2253_s23  ;;  %p2262_p8 = scmp.lt.s32.totalorder %s2253_s23, %s2253_s23 }
  0xdb   : > { %p2256_p3 = pnand %p2254_p5, %p2755_p4  ;;  %p2263_p10 = por %p2262_p8, %p2261_p6 }
  0xdd   : > { %p2257_p9 = pneg %p2256_p3 }
  0xdf   : > { %p2264_p13 = pnand %p2263_p10, %p2257_p9 }
  0xe1   : > { %2267 = shalt.err (!%p2264_p13)
}
  0xe2   : > { %1921 = dma.hbm_to_vmem [thread:$0]  (!%p3309_p2), %s3242_s5, 256, %s435_s11, [#allocation13], %s2560_s0, %s2560_s0, %s2561_s25  }
  0xe3   : > { %s2268_s24 = scalar_lea.hbm %s3244_s7, 256 }
  0xe4   : > { %p2269_p7 = scmp.ne.s32.totalorder %s3244_s7, %s2268_s24  ;;  %p2275_p1 = scmp.lt.u32.totalorder %s2268_s24, %s3244_s7 }
  0xe6   : > { %p2271_p13 = pnand %p2269_p7, %p2755_p4 }
  0xe8   : > { %p2272_p0 = pneg %p2271_p13 }
  0xea   : > { %p2277_p11 = pnand %p2275_p1, %p2272_p0 }
  0xec   : > { %2280 = shalt.err (!%p2277_p11)
}
  0xed   : > { %s2281_s4 = scalar_lea.vmem %s459_s1, 256  ;;  %p2289_p9 = scmp.lt.s32.totalorder %s459_s1, %s459_s1 }
  0xee   : > { %p2282_p12 = scmp.ne.s32.totalorder %s459_s1, %s2281_s4  ;;  %p2290_p6 = scmp.lt.s32.totalorder %s2281_s4, %s2281_s4 }
  0xf0   : > { %p2284_p5 = pnand %p2282_p12, %p2755_p4  ;;  %p2291_p8 = por %p2290_p6, %p2289_p9 }
  0xf2   : > { %p2285_p3 = pneg %p2284_p5 }
  0xf4   : > { %p2292_p10 = pnand %p2291_p8, %p2285_p3 }
  0xf6   : > { %2295 = shalt.err (!%p2292_p10)
}
  0xf7   : > { %1927 = dma.hbm_to_vmem [thread:$0]  (!%p3309_p2), %s3244_s7, 256, %s459_s1, [#allocation16], %s2560_s0, %s2560_s0, %s2561_s25  }
  0xf8   : > { %s2564_s23 = smov [#allocation20]   ;;  %s2565_s27 = smov [#allocation21]  }
  0xf9   : > { %s483_s30 = sshll.u32 %s2564_s23, 4  ;;  %s494_s16 = sshll.u32 %s2565_s27, 4  ;;  %s484_s30 = int_to_ptr.vmem [resolvable:$true] %s483_s30  ;;  %s495_s16 = int_to_ptr.vmem [resolvable:$true] %s494_s16 }
  0xfa   : > { %s2296_s15 = scalar_lea.hbm %s3246_s9, 16 }
  0xfb   : > { %p2297_p7 = scmp.ne.s32.totalorder %s3246_s9, %s2296_s15  ;;  %p2303_p1 = scmp.lt.u32.totalorder %s2296_s15, %s3246_s9 }
  0xfd   : > { %p2299_p13 = pnand %p2297_p7, %p2755_p4 }
  0xff   : > { %p2300_p0 = pneg %p2299_p13 }
 0x101   : > { %p2305_p11 = pnand %p2303_p1, %p2300_p0 }
 0x103   : > { %2308 = shalt.err (!%p2305_p11)
}
 0x104   : > { %s2309_s0 = scalar_lea.vmem %s484_s30, 16  ;;  %s2316_s25 = scalar_lea.vmem %s484_s30, 32 }
 0x105   : > { %p2310_p12 = scmp.ne.s32.totalorder %s484_s30, %s2309_s0  ;;  %p2317_p9 = scmp.lt.s32.totalorder %s484_s30, %s484_s30 }
 0x106   : > { %p2318_p6 = scmp.lt.s32.totalorder %s2316_s25, %s2309_s0 }
 0x107   : > { %p2312_p5 = pnand %p2310_p12, %p2755_p4 }
 0x108   : > { %p2319_p8 = por %p2318_p6, %p2317_p9 }
 0x109   : > { %p2313_p3 = pneg %p2312_p5 }
 0x10b   : > { %p2320_p10 = pnand %p2319_p8, %p2313_p3 }
 0x10d   : > { %2323 = shalt.err (!%p2320_p10)
}
 0x10e   : > { %1933 = dma.hbm_to_vmem [thread:$0]  (!%p3309_p2), %s3246_s9, 16, %s484_s30, [#allocation19]  }
 0x10f   : > { %s2324_s27 = scalar_lea.hbm %s3247_s10, 16 }
 0x110   : > { %p2325_p7 = scmp.ne.s32.totalorder %s3247_s10, %s2324_s27  ;;  %p2331_p1 = scmp.lt.u32.totalorder %s2324_s27, %s3247_s10 }
 0x112   : > { %p2327_p13 = pnand %p2325_p7, %p2755_p4 }
 0x114   : > { %p2328_p0 = pneg %p2327_p13 }
 0x116   : > { %p2333_p11 = pnand %p2331_p1, %p2328_p0 }
 0x118   : > { %2336 = shalt.err (!%p2333_p11)
}
 0x119   : > { %s2337_s28 = scalar_lea.vmem %s495_s16, 16  ;;  %s2344_s30 = scalar_lea.vmem %s495_s16, 32 }
 0x11a   : > { %p2338_p12 = scmp.ne.s32.totalorder %s495_s16, %s2337_s28  ;;  %p2345_p9 = scmp.lt.s32.totalorder %s495_s16, %s495_s16 }
 0x11b   : > { %p2346_p6 = scmp.lt.s32.totalorder %s2344_s30, %s2337_s28 }
 0x11c   : > { %p2340_p5 = pnand %p2338_p12, %p2755_p4 }
 0x11d   : > { %p2347_p8 = por %p2346_p6, %p2345_p9 }
 0x11e   : > { %p2341_p3 = pneg %p2340_p5 }
 0x120   : > { %p2348_p10 = pnand %p2347_p8, %p2341_p3 }
 0x122   : > { %2351 = shalt.err (!%p2348_p10)
}
 0x123   : > { %1936 = dma.hbm_to_vmem [thread:$0]  (!%p3309_p2), %s3247_s10, 16, %s495_s16, [#allocation22]  }
 0x124   : > { %s1718_s0 = sshll.u32 %s2548_s29, 7  ;;  %s528_s25 = scalar_lea.vmem [#allocation10], %s2838_s22 }
 0x125   : > { %s536_s21 = sshll.u32 %s528_s25, 4  ;;  %s534_s8 = scalar_lea.hbm %s3239_s2, %s1718_s0  ;;  %s537_s21 = int_to_ptr.vmem [resolvable:$true] %s536_s21 }
 0x126   : > { %s2352_s23 = scalar_lea.hbm %s534_s8, 128  ;;  %p3310_p7 = scmp.ne.s32.totalorder %s3308_s6, 0 }
 0x127   : > { %p2353_p4 = scmp.ne.s32.totalorder %s534_s8, %s2352_s23  ;;  %s2357_s18 = scalar_lea.hbm %s3239_s2, 256 }
 0x128   : > { %p3311_p13 = pneg %p3310_p7  ;;  %p2358_p2 = scmp.lt.u32.totalorder %s534_s8, %s3239_s2 }
 0x129   : > { %p2359_p11 = scmp.lt.u32.totalorder %s2357_s18, %s2352_s23  ;;  %p2361_p5 = scmp.lt.u32.totalorder %s2352_s23, %s534_s8 }
 0x12a   : > { %p2355_p0 = pnand %p2353_p4, %p3311_p13 }
 0x12b   : > { %p2360_p12 = por %p2359_p11, %p2358_p2 }
 0x12c   : > { %p2356_p1 = pneg %p2355_p0 }
 0x12d   : > { %p2362_p3 = por %p2361_p5, %p2360_p12 }
 0x12f   : > { %p2363_p9 = pnand %p2362_p3, %p2356_p1 }
 0x131   : > { %2366 = shalt.err (!%p2363_p9)
}
 0x132   : > { %s2367_s22 = scalar_lea.vmem %s537_s21, 128  ;;  %p3312_p8 = pmov %p3311_p13 }
 0x133   : > { %p2368_p6 = scmp.ne.s32.totalorder %s537_s21, %s2367_s22  ;;  %s2566_s15 = smov [#allocation10]  }
 0x134   : > { %s2372_s12 = sshll.u32 %s2566_s15, 4  ;;  %s2373_s12 = int_to_ptr.vmem [resolvable:$false] %s2372_s12 }
 0x135   : > { %p2370_p10 = pnand %p2368_p6, %p3312_p8  ;;  %s2374_s28 = scalar_lea.vmem %s2373_s12, 256 }
 0x136   : > { %p2375_p13 = scmp.lt.s32.totalorder %s537_s21, %s2373_s12  ;;  %p2376_p0 = scmp.lt.s32.totalorder %s2374_s28, %s2367_s22 }
 0x137   : > { %p2371_p4 = pneg %p2370_p10 }
 0x138   : > { %p2377_p2 = por %p2376_p0, %p2375_p13 }
 0x13a   : > { %p2378_p11 = pnand %p2377_p2, %p2371_p4 }
 0x13c   : > { %2381 = shalt.err (!%p2378_p11)
}
 0x13d   : > { %1943 = dma.hbm_to_vmem [thread:$0]  (!%p3310_p7), %s534_s8, 128, %s537_s21, %s2842_s17  }
 0x13e   : > { %p3313_p1 = scmp.ne.s32.totalorder %s3293_s19, 0 }
 0x13f   : > { %s3314_s30 = sld [smem:[#allocation40_spill]] (!%p3313_p1)  ;;  %s547_s13 = sand.u32 (!%p3313_p1), 1, %s2678_s14  }
 0x140   : > { %545 = sbr.rel (%p3313_p1) target bundleno = 2001 (0x7d1), region = 64  ;;  %s2993_s4 = sand.u32 (!%p3313_p1), 1, %s2536_s26  }
 0x141   : > { %s2996_s0 = sshll.u32 (!%p3313_p1), %s2993_s4, 2  ;;  %s548_s25 = scalar_lea.sflag (!%p3313_p1), [#allocation6], %s547_s13 }
 0x142   : > { %s551_s1 = scalar_lea.vmem (!%p3313_p1), [#allocation5], %s2996_s0 }
 0x145   : > { %p3315_p12 = scmp.ne.s32.totalorder (!%p3313_p1), %s3314_s30, 0 }
 0x147   : > { %2491 = dma.done.wait (%p3315_p12), %s548_s25, 64  }
 0x148   : > { %2493 = vsyncadd (%p3315_p12), %s548_s25, 4294967232 }
 0x149   : > { %2495 = dma.done.wait (%p3315_p12), [#allocation9], 64  }
 0x14a   : > { %2497 = vsyncadd (%p3315_p12), [#allocation9], 4294967232  ;;  %s1721_s6 = sshll.u32 %s2993_s4, 3 }
 0x14b   : > { %s3010_s19 = scalar_lea.vmem [#allocation10], %s1721_s6 }
 0x14c   : > { %2499 = dma.done.wait (%p3315_p12), %s548_s25, 128  }
 0x14d   : > { %2501 = vsyncadd (%p3315_p12), %s548_s25, 4294967168  ;;  %p3316_p7 = scmp.eq.s32.totalorder %s2678_s14, 0 }
 0x14f   : > { %2503 = dma.done.wait (%p3316_p7), [#allocation9], 256   ;;  %p3317_p5 = pmov %p3316_p7 }
 0x151   : > { %2505 = vsyncadd (%p3317_p5), [#allocation9], 4294967040  ;;  %p3318_p3 = pmov %p3317_p5 }
 0x153   : > { %2507 = dma.done.wait (%p3318_p3), [#allocation13], 272   ;;  %p3319_p9 = pmov %p3318_p3 }
 0x154   : > { %p3320_p6 = pmov %p3318_p3 }
 0x155   : > { %2509 = vsyncadd (%p3319_p9), [#allocation13], 4294967024 }
 0x156   : > { %2511 = dma.done.wait (%p3320_p6), [#allocation16], 272   ;;  %p3321_p8 = pmov %p3318_p3 }
 0x157   : > { %p3322_p10 = pmov %p3318_p3 }
 0x158   : > { %2513 = vsyncadd (%p3321_p8), [#allocation16], 4294967024 }
 0x159   : > { %2515 = dma.done.wait (%p3322_p10), [#allocation19], 32   ;;  %p3323_p4 = pmov %p3318_p3 }
 0x15a   : > { %p3324_p13 = pmov %p3318_p3 }
 0x15b   : > { %2517 = vsyncadd (%p3323_p4), [#allocation19], 4294967264 }
 0x15c   : > { %2519 = dma.done.wait (%p3324_p13), [#allocation22], 16   ;;  %p3325_p0 = pmov %p3318_p3 }
 0x15d   : > { %v2567_v0 = vmov 0.0   ;;  %vm2568_vm0 = vmmov 0   ;;  %v2041_v1 = vld [vmem:[#allocation14] sm:$0xff]   ;;  %v2042_v2 = vld [vmem:[#allocation11] sm:$0xff]   ;;  %v2044_v4 = vld [vmem:[#allocation11 + $0x8] sm:$0xff]   ;;  %vm686_vm1 = vcmask 261120  }
 0x15e   : > { %2521 = vsyncadd (%p3325_p0), [#allocation22], 4294967280  ;;  %1793 = vmatprep.subr.bf16.mxu0 %v2567_v0  ;;  %1801 = vmatprep.subr.bf16.mxu1 %v2567_v0  ;;  %v2043_v3 = vld [vmem:[#allocation14 + $0x8] sm:$0xff]   ;;  %v662_v5 = vld [vmem:[#allocation8] sm:$0xf]  ;;  %vm731_vm2 = vcmask 257024  }
 0x15f   : > { %1797 = vmatprep.mubr.msk.bf16.mxu0 %vm2568_vm0, %v2567_v0  ;;  %1805 = vmatprep.mubr.msk.bf16.mxu1 %vm2568_vm0, %v2567_v0  ;;  %v3046_v6 = vld [vmem:[%s551_s1] sm:$0xf]  ;;  %v1733_v7 = vld [vmem:[#allocation15] ss:$0 sm:$0xff]  ;;  %v1738_v8 = vld [vmem:[#allocation12] ss:$0 sm:$0xff] }
 0x160   : > { %1794 = vmatpush3.bf16.msra.mxu0 %v2041_v1  ;;  %1802 = vmatpush3.bf16.msra.mxu1 %v2042_v2  ;;  %s646_s17 = scalar_lea.vmem [#allocation24], %s2996_s0  ;;  %s2569_s21 = smov 112   ;;  %vm757_vm3 = vcmask 64512   ;;  %vm834_vm4 = vcmask 1043456   ;;  %v657_v39 = vld [vmem:[%s3010_s19] sm:$0xff]  ;;  %vm1057_vm5 = vcmask 130112  }
 0x161   : > { %1795 = vmatprep.subr.bf16.mxu0 %v2567_v0  ;;  %1803 = vmatprep.subr.bf16.mxu1 %v2567_v0  ;;  %s2570_s11 = smov 104   ;;  %s2571_s8 = smov 96   ;;  %vm1176_vm6 = vcmask 195712   ;;  %vm1297_vm7 = vcmask 261312  }
 0x162   : > { %s2572_s23 = smov 120   ;;  %s653_s20 = scalar_lea.vmem [#allocation26], %s2996_s0 }
 0x163   : > { %s2573_s27 = smov 8   ;;  %s2574_s18 = smov 16  }
 0x164   : > { %1796 = vmatpush3.bf16.msra.mxu0 %v2043_v3  ;;  %1804 = vmatpush3.bf16.msra.mxu1 %v2044_v4  ;;  %s2575_s24 = smov 24   ;;  %s3326_s16 = sld [smem:[#allocation42_spill]] }
 0x165   : > { %1809 = vmatprep.subr.bf16.mxu0 %v2567_v0  ;;  %1815 = vmatprep.subr.bf16.mxu1 %v2567_v0  ;;  %s3327_s22 = sld [smem:[#allocation44_spill]]  ;;  %s3328_s28 = sld [smem:[#allocation52_spill]] }
 0x166   : > { %s1439_s25 = sshll.u32 %s646_s17, 4  ;;  %s3140_s6 = scalar_lea.sflag [#allocation25], %s547_s13  ;;  %s1440_s25 = int_to_ptr.vmem [resolvable:$true] %s1439_s25 }
 0x167   : > { %1798 = vmatmul.mubr.msk.bf16.vlgmr.msra.gmra.mrb[0].mxu0 %vm686_vm1, %v662_v5  ;;  %1806 = vmatmul.mubr.msk.bf16.vlgmr.msra.gmra.mrb[0].mxu1 %vm686_vm1, %v3046_v6  ;;  %s2382_s19 = scalar_lea.vmem %s1440_s25, 64 }
 0x168   : > { %1811 = vmatprep.mubr.msk.bf16.mxu0 %vm2568_vm0, %v2567_v0  ;;  %1817 = vmatprep.mubr.msk.bf16.mxu1 %vm2568_vm0, %v2567_v0  ;;  %p2383_p2 = scmp.ne.s32.totalorder %s1440_s25, %s2382_s19 }
 0x16b   : > { %s3329_s1 = smov %s3328_s28  ;;  %s3134_s30 = scalar_lea.hbm %s3328_s28, %s3326_s16 }
 0x16c   : > { %p3330_p11 = scmp.ne.s32.totalorder %s3327_s22, 0 }
 0x16e   : > { %p2384_p1 = pnand %p2383_p2, %p3330_p11 }
 0x170   : > { %p2385_p12 = pneg %p2384_p1 }
 0x23a   : > { %v724_v9 = vpop.f32.mrb[0].mxu0  ;;  %v821_v11 = vpop.f32.mrb[0].mxu1 }
 0x23b   : > { %v725_v10 = vadd.f32 %v1733_v7, %v724_v9  ;;  %v1799_v12 = vpop.f32.mrb[1].mxu0  ;;  %v822_v13 = vadd.f32 %v1738_v8, %v821_v11  ;;  %v1807_v15 = vpop.f32.mrb[1].mxu1 }
 0x23c   : > { %v727_v14 = vpop.f32.mrb[2].mxu0  ;;  %v824_v18 = vpop.f32.mrb[2].mxu1 }
 0x23d   : > { %v730_v16 = vpack.c.bf16 %v725_v10, %v725_v10  ;;  %v1800_v17 = vpop.f32.mrb[3].mxu0  ;;  %v827_v19 = vpack.c.bf16 %v822_v13, %v822_v13  ;;  %v1808_v20 = vpop.f32.mrb[3].mxu1 }
 0x23f   : > { %741 = vxpose.xlu0.c.b16.start.end [1/1] (short) (narrow) %v730_v16, 32  ;;  %732 = vst.msk [vmem:[%s646_s17] sm:$0xf] %vm731_vm2, %v730_v16  ;;  %1061 = vrot.lane.b32.xlu1 %v827_v19, %s2569_s21 }
 0x243   : > { %1180 = vrot.lane.b32.xlu1 %v827_v19, %s2570_s11 }
 0x247   : > { %736 = vrot.lane.b32.xlu1 %v730_v16, %s2571_s8 }
 0x24c   : > { %940 = vrot.lane.b32.xlu0 %v827_v19, %s2572_s23 }
 0x2a5   : > { %v749_v21 = vpop.trf.xlu0 }
 0x2a6   : > { %758 = vst.msk [vmem:[#allocation2] sm:$0xff] %vm757_vm3, %v749_v21 }
 0x2a9   : > { %v750_v22 = vpop.trf.xlu0 }
 0x2aa   : > { %759 = vst.msk [vmem:[#allocation2 + $0x8] sm:$0xff] %vm757_vm3, %v750_v22 }
 0x2ad   : > { %v828_v23 = vld [vmem:[#allocation2] sm:$0xf]  ;;  %v937_v24 = vld [vmem:[#allocation2] sm:$0xf0] }
 0x2ae   : > { %v836_v25 = vsel %vm834_vm4, %v828_v23, 0  ;;  %v943_v26 = vrot.slane %v937_v24, 4 }
 0x2af   : > { %1810 = vmatpush3.bf16.msra.mxu0 %v836_v25 }
 0x2b0   : > { %1821 = vmatprep.subr.bf16.mxu0 %v2567_v0  ;;  %v948_v28 = vsel %vm834_vm4, %v943_v26, 0 }
 0x2b1   : > { %v1062_v27 = vpop.permute.xlu1 %1061  ;;  %v1059_v31 = vld [vmem:[#allocation2 + $0x8] sm:$0xf]  ;;  %v1178_v34 = vld [vmem:[#allocation2 + $0x8] sm:$0xf0] }
 0x2b2   : > { %1812 = vmatmul.mubr.msk.bf16.vlgmr.msra.gmra.mrb[4].mxu0 %vm757_vm3, %v827_v19  ;;  %v1067_v32 = vsel %vm834_vm4, %v1059_v31, 0  ;;  %v1183_v35 = vrot.slane %v1178_v34, 4 }
 0x2b3   : > { %1822 = vmatpush3.bf16.msra.mxu0 %v948_v28  ;;  %1823 = vmatprep.mubr.msk.bf16.mxu0 %vm2568_vm0, %v2567_v0 }
 0x2b4   : > { %1833 = vmatprep.subr.bf16.mxu0 %v2567_v0  ;;  %v1188_v38 = vsel %vm834_vm4, %v1183_v35, 0 }
 0x2b5   : > { %v1181_v29 = vpop.permute.xlu1 %1180 }
 0x2b9   : > { %v737_v30 = vpop.permute.xlu1 %736 }
 0x2ba   : > { %739 = vst.msk [vmem:[%s653_s20] sm:$0xf] %vm731_vm2, %v737_v30  ;;  %740 = vst.msk [vmem:[#allocation3] sm:$0xf] %vm731_vm2, %v737_v30 }
 0x2be   : > { %v941_v33 = vpop.permute.xlu0 %940 }
 0x2bf   : > { %1824 = vmatmul.mubr.msk.bf16.vlgmr.msra.gmra.mrb[8].mxu0 %vm757_vm3, %v941_v33 }
 0x2c0   : > { %1834 = vmatpush3.bf16.msra.mxu0 %v1067_v32  ;;  %1835 = vmatprep.mubr.msk.bf16.mxu0 %vm2568_vm0, %v2567_v0 }
 0x2c1   : > { %1845 = vmatprep.subr.bf16.mxu0 %v2567_v0  ;;  %v829_v36 = vld [vmem:[#allocation3] sm:$0xf] }
 0x2c2   : > { %v892_v37 = vsel %vm834_vm4, %v829_v36, 0  ;;  %v2045_v52 = vld [vmem:[#allocation3] ss:$0 sps:$4 sm:$0xff]  }
 0x2c3   : > { %1816 = vmatpush3.bf16.msra.mxu1 %v892_v37  ;;  %v2046_v63 = vld [vmem:[#allocation3] ss:$0 sps:$4 sm:$0xff]  }
 0x2c4   : > { %1827 = vmatprep.subr.bf16.mxu1 %v2567_v0  ;;  %v2047_v3 = vld [vmem:[#allocation3] ss:$0 sps:$4 sm:$0xff]  }
 0x2c7   : > { %1836 = vmatmul.mubr.msk.bf16.vlgmr.msra.gmra.mrb[12].mxu0 %vm757_vm3, %v1062_v27 }
 0x2c8   : > { %1846 = vmatpush3.bf16.msra.mxu0 %v1188_v38  ;;  %1847 = vmatprep.mubr.msk.bf16.mxu0 %vm2568_vm0, %v2567_v0 }
 0x2c9   : > { %1857 = vmatprep.subr.bf16.mxu0 %v2567_v0 }
 0x2cf   : > { %1848 = vmatmul.mubr.msk.bf16.vlgmr.msra.gmra.mrb[16].mxu0 %vm757_vm3, %v1181_v29 }
 0x2d0   : > { %1861 = vmatprep.mubr.msk.bf16.mxu0 %vm2568_vm0, %v2567_v0 }
 0x385   : > { %v872_v40 = vpop.f32.mrb[4].mxu0 }
 0x386   : > { %v873_v41 = vadd.f32 %v872_v40, %v657_v39  ;;  %v1813_v42 = vpop.f32.mrb[5].mxu0 }
 0x387   : > { %v875_v43 = vpop.f32.mrb[6].mxu0 }
 0x388   : > { %v1814_v44 = vpop.f32.mrb[7].mxu0  ;;  %v878_v45 = vsel %vm757_vm3, %v873_v41, -inf }
 0x389   : > { %879 = vmax.xlane.f32.xlu1 %v878_v45 }
 0x392   : > { %v984_v46 = vpop.f32.mrb[8].mxu0 }
 0x393   : > { %v985_v47 = vadd.f32 %v984_v46, %v657_v39  ;;  %v1825_v48 = vpop.f32.mrb[9].mxu0 }
 0x394   : > { %v987_v49 = vpop.f32.mrb[10].mxu0 }
 0x395   : > { %v990_v50 = vsel %vm757_vm3, %v985_v47, -inf  ;;  %v1826_v51 = vpop.f32.mrb[11].mxu0 }
 0x396   : > { %991 = vmax.xlane.f32.xlu0 %v990_v50 }
 0x39a   : > { %1122 = vrot.lane.b32.xlu1 %v2045_v52, %s2569_s21  ;;  %v1103_v53 = vpop.f32.mrb[12].mxu0  ;;  %s2576_s21 = smov [#allocation24]  }
 0x39b   : > { %v1104_v54 = vadd.f32 %v1103_v53, %v657_v39  ;;  %v1837_v55 = vpop.f32.mrb[13].mxu0 }
 0x39c   : > { %v1106_v56 = vpop.f32.mrb[14].mxu0 }
 0x39d   : > { %v1109_v57 = vsel %vm757_vm3, %v1104_v54, -inf  ;;  %v1838_v58 = vpop.f32.mrb[15].mxu0 }
 0x39e   : > { %1110 = vmax.xlane.f32.xlu0 %v1109_v57  ;;  %v2048_v57 = vld [vmem:[#allocation17] sm:$0xff]   ;;  %v2049_v58 = vld [vmem:[#allocation17 + $0x8] sm:$0xff]  }
 0x39f   : > { %1858 = vmatpush3.bf16.msra.mxu0 %v2048_v57 }
 0x3a0   : > { %1859 = vmatprep.subr.bf16.mxu0 %v2567_v0 }
 0x3a2   : > { %v1224_v59 = vpop.f32.mrb[16].mxu0 }
 0x3a3   : > { %v1849_v60 = vpop.f32.mrb[17].mxu0  ;;  %v1225_v1 = vadd.f32 %v1224_v59, %v657_v39  ;;  %1860 = vmatpush3.bf16.msra.mxu0 %v2049_v58 }
 0x3a4   : > { %v1227_v61 = vpop.f32.mrb[18].mxu0 }
 0x3a5   : > { %v1850_v62 = vpop.f32.mrb[19].mxu0  ;;  %v1230_v2 = vsel %vm757_vm3, %v1225_v1, -inf }
 0x3b4   : > { %1003 = vrot.lane.b32.xlu0 %v2046_v63, %s2572_s23 }
 0x3be   : > { %1231 = vmax.xlane.f32.xlu1 %v1230_v2 }
 0x3cf   : > { %1243 = vrot.lane.b32.xlu1 %v2047_v3, %s2570_s11  ;;  %s2386_s11 = sshll.u32 %s2576_s21, 4  ;;  %s2387_s11 = int_to_ptr.vmem [resolvable:$false] %s2386_s11 }
 0x3d0   : > { %s2388_s8 = scalar_lea.vmem %s2387_s11, 128  ;;  %p2389_p7 = scmp.lt.s32.totalorder %s1440_s25, %s2387_s11 }
 0x3d1   : > { %p2390_p5 = scmp.lt.s32.totalorder %s2388_s8, %s2382_s19 }
 0x3d3   : > { %p2391_p3 = por %p2390_p5, %p2389_p7 }
 0x3d5   : > { %p2392_p9 = pnand %p2391_p3, %p2385_p12 }
 0x416   : > { %v880_v4 = vpop.xlane.xlu1 %879 }
 0x417   : > { %v881_v5 = vsub.f32 %v873_v41, %v880_v4 }
 0x419   : > { %v882_v7 = vmul.f32 1.442695, %v881_v5 }
 0x41a   : > { %v1123_v19 = vpop.permute.xlu1 %1122 }
 0x41b   : > { %2050 = vpow2.f32 %v882_v7  ;;  %v1128_v22 = vsel %vm834_vm4, %v1123_v19, 0  ;;  %v1753_v7 = vld [vmem:[#allocation18] ss:$0 sm:$0xff] }
 0x423   : > { %v992_v8 = vpop.xlane.xlu0 %991 }
 0x424   : > { %v993_v9 = vsub.f32 %v985_v47, %v992_v8  ;;  %v656_v8 = vunpack.c.l.bf16 %v3046_v6 }
 0x425   : > { %v2051_v10 = vpop.eup %2050 }
 0x426   : > { %v994_v11 = vmul.f32 1.442695, %v993_v9  ;;  %v887_v12 = vpack.c.bf16 %v2051_v10, %v2051_v10  ;;  %v884_v34 = vsel %vm757_vm3, %v2051_v10, 0.0 }
 0x428   : > { %2052 = vpow2.f32 %v994_v11  ;;  %1818 = vmatmul.mubr.msk.bf16.vlgmr.msra.gmra.mrb[4].mxu1 %vm757_vm3, %v887_v12 }
 0x429   : > { %1829 = vmatprep.mubr.msk.bf16.mxu1 %vm2568_vm0, %v2567_v0 }
 0x42b   : > { %v1111_v13 = vpop.xlane.xlu0 %1110 }
 0x42c   : > { %v1112_v14 = vsub.f32 %v1104_v54, %v1111_v13 }
 0x42e   : > { %v1113_v15 = vmul.f32 1.442695, %v1112_v14 }
 0x42f   : > { %v1004_v16 = vpop.permute.xlu0 %1003 }
 0x430   : > { %2054 = vpow2.f32 %v1113_v15  ;;  %v1009_v17 = vsel %vm834_vm4, %v1004_v16, 0 }
 0x431   : > { %1828 = vmatpush3.bf16.msra.mxu1 %v1009_v17 }
 0x432   : > { %v2053_v18 = vpop.eup %2052  ;;  %1839 = vmatprep.subr.bf16.mxu1 %v2567_v0 }
 0x433   : > { %v996_v20 = vsel %vm757_vm3, %v2053_v18, 0.0  ;;  %v999_v21 = vpack.c.bf16 %v2053_v18, %v2053_v18 }
 0x434   : > { %997 = vadd.xlane.f32.xlu1 %v996_v20 }
 0x435   : > { %1830 = vmatmul.mubr.msk.bf16.vlgmr.msra.gmra.mrb[8].mxu1 %vm757_vm3, %v999_v21 }
 0x436   : > { %1840 = vmatpush3.bf16.msra.mxu1 %v1128_v22  ;;  %1841 = vmatprep.mubr.msk.bf16.mxu1 %vm2568_vm0, %v2567_v0 }
 0x437   : > { %1851 = vmatprep.subr.bf16.mxu1 %v2567_v0 }
 0x43a   : > { %v2055_v23 = vpop.eup %2054 }
 0x43b   : > { %v1115_v24 = vsel %vm757_vm3, %v2055_v23, 0.0  ;;  %v1118_v25 = vpack.c.bf16 %v2055_v23, %v2055_v23 }
 0x43c   : > { %1116 = vadd.xlane.f32.xlu0 %v1115_v24 }
 0x43d   : > { %1842 = vmatmul.mubr.msk.bf16.vlgmr.msra.gmra.mrb[12].mxu1 %vm757_vm3, %v1118_v25 }
 0x43e   : > { %1853 = vmatprep.mubr.msk.bf16.mxu1 %vm2568_vm0, %v2567_v0 }
 0x44b   : > { %v1232_v26 = vpop.xlane.xlu1 %1231 }
 0x44c   : > { %v1233_v27 = vsub.f32 %v1225_v1, %v1232_v26 }
 0x44e   : > { %v1234_v28 = vmul.f32 1.442695, %v1233_v27 }
 0x44f   : > { %v1244_v29 = vpop.permute.xlu1 %1243 }
 0x450   : > { %2056 = vpow2.f32 %v1234_v28  ;;  %v1249_v30 = vsel %vm834_vm4, %v1244_v29, 0 }
 0x451   : > { %1852 = vmatpush3.bf16.msra.mxu1 %v1249_v30 }
 0x45a   : > { %v2057_v31 = vpop.eup %2056 }
 0x45b   : > { %v1236_v32 = vsel %vm757_vm3, %v2057_v31, 0.0  ;;  %v1239_v33 = vpack.c.bf16 %v2057_v31, %v2057_v31 }
 0x45c   : > { %1237 = vadd.xlane.f32.xlu0 %v1236_v32 }
 0x45d   : > { %1854 = vmatmul.mubr.msk.bf16.vlgmr.msra.gmra.mrb[16].mxu1 %vm757_vm3, %v1239_v33 }
 0x460   : > { %885 = vadd.xlane.f32.xlu0 %v884_v34 }
 0x4c1   : > { %v998_v39 = vpop.xlane.xlu1 %997 }
 0x4c9   : > { %v1117_v35 = vpop.xlane.xlu0 %1116 }
 0x4e9   : > { %v1238_v36 = vpop.xlane.xlu0 %1237 }
 0x4ed   : > { %v886_v37 = vpop.xlane.xlu0 %885 }
 0x4ee   : > { %2058 = vrcp.f32 %v886_v37 }
 0x4ef   : > { %2060 = vrcp.f32 %v998_v39 }
 0x4f0   : > { %2062 = vrcp.f32 %v1117_v35 }
 0x4f1   : > { %2064 = vrcp.f32 %v1238_v36 }
 0x4f8   : > { %v2059_v38 = vpop.eup %2058 }
 0x4f9   : > { %v2061_v45 = vpop.eup %2060 }
 0x4fa   : > { %v2063_v51 = vpop.eup %2062 }
 0x4fb   : > { %v928_v40 = vpop.f32.mrb[4].mxu1  ;;  %v2065_v59 = vpop.eup %2064 }
 0x4fc   : > { %v935_v41 = vmul.f32 %v2059_v38, %v928_v40  ;;  %v1819_v42 = vpop.f32.mrb[5].mxu1 }
 0x4fd   : > { %v931_v43 = vpop.f32.mrb[6].mxu1 }
 0x4fe   : > { %936 = vst.msk [vmem:[#allocation4] sm:$0xff] %vm757_vm3, %v935_v41  ;;  %v1820_v44 = vpop.f32.mrb[7].mxu1 }
 0x508   : > { %v1045_v46 = vpop.f32.mrb[8].mxu1 }
 0x509   : > { %v1052_v47 = vmul.f32 %v2061_v45, %v1045_v46  ;;  %v1831_v48 = vpop.f32.mrb[9].mxu1 }
 0x50a   : > { %v1048_v49 = vpop.f32.mrb[10].mxu1 }
 0x50b   : > { %1054 = vrot.lane.b32.xlu1 %v1052_v47, %s2573_s27  ;;  %v1832_v50 = vpop.f32.mrb[11].mxu1 }
 0x510   : > { %v1164_v52 = vpop.f32.mrb[12].mxu1 }
 0x511   : > { %v1171_v53 = vmul.f32 %v2063_v51, %v1164_v52  ;;  %v1843_v54 = vpop.f32.mrb[13].mxu1 }
 0x512   : > { %v1167_v55 = vpop.f32.mrb[14].mxu1 }
 0x513   : > { %1173 = vrot.lane.b32.xlu0 %v1171_v53, %s2574_s18  ;;  %v1844_v56 = vpop.f32.mrb[15].mxu1 }
 0x530   : > { %v1285_v60 = vpop.f32.mrb[16].mxu1 }
 0x531   : > { %v1292_v61 = vmul.f32 %v2065_v59, %v1285_v60  ;;  %v1855_v62 = vpop.f32.mrb[17].mxu1 }
 0x532   : > { %v1288_v63 = vpop.f32.mrb[18].mxu1 }
 0x533   : > { %1294 = vrot.lane.b32.xlu1 %v1292_v61, %s2575_s24  ;;  %v1856_v1 = vpop.f32.mrb[19].mxu1 }
 0x57d   : > { %v1055_v2 = vpop.permute.xlu1 %1054 }
 0x57e   : > { %1058 = vst.msk [vmem:[#allocation4] sm:$0xff] %vm1057_vm5, %v1055_v2 }
 0x585   : > { %v1174_v3 = vpop.permute.xlu0 %1173 }
 0x586   : > { %1177 = vst.msk [vmem:[#allocation4] sm:$0xff] %vm1176_vm6, %v1174_v3 }
 0x5a5   : > { %v1295_v4 = vpop.permute.xlu1 %1294 }
 0x5a6   : > { %1298 = vst.msk [vmem:[#allocation4] sm:$0xff] %vm1297_vm7, %v1295_v4 }
 0x5ad   : > { %v1299_v5 = vld [vmem:[#allocation4] sm:$0xff] }
 0x5ae   : > { %v1300_v0 = vpack.c.bf16 %v1299_v5, %v1299_v5 }
 0x5b0   : > { %1862 = vmatmul.mubr.msk.bf16.vlgmr.msra.gmra.mrb[20].mxu0 %vm686_vm1, %v1300_v0 }
 0x683   : > { %v1361_v9 = vpop.f32.mrb[20].mxu0 }
 0x684   : > { %v1362_v10 = vadd.f32 %v1753_v7, %v1361_v9  ;;  %v1863_v11 = vpop.f32.mrb[21].mxu0 }
 0x685   : > { %v1364_v12 = vpop.f32.mrb[22].mxu0 }
 0x686   : > { %v1864_v13 = vpop.f32.mrb[23].mxu0  ;;  %v1367_v14 = vadd.f32 %v1362_v10, %v656_v8 }
 0x688   : > { %v1368_v15 = vsel %vm686_vm1, %v1367_v14, 0.0 }
 0x689   : > { %1369 = vadd.xlane.f32.xlu1 %v1368_v15 }
 0x716   : > { %v1370_v16 = vpop.xlane.xlu1 %1369 }
 0x717   : > { %v1372_v17 = vmul.f32 0.03125, %v1370_v16 }
 0x719   : > { %v3125_v18 = vsub.f32 %v1367_v14, %v1372_v17 }
 0x71b   : > { %v1374_v19 = vmul.f32 %v3125_v18, %v3125_v18 }
 0x71d   : > { %v1375_v6 = vsel %vm686_vm1, %v1374_v19, 0.0 }
 0x71e   : > { %1376 = vadd.xlane.f32.xlu0 %v1375_v6 }
 0x71f   : > { %2395 = shalt.err (!%p2392_p9)
}
 0x720   : > { %s2396_s14 = scalar_lea.hbm %s3134_s30, 64  ;;  %s2400_s23 = scalar_lea.hbm %s3329_s1, 128 }
 0x721   : > { %p2397_p6 = scmp.ne.s32.totalorder %s3134_s30, %s2396_s14  ;;  %p2401_p4 = scmp.lt.u32.totalorder %s3134_s30, %s3329_s1 }
 0x722   : > { %p2402_p13 = scmp.lt.u32.totalorder %s2400_s23, %s2396_s14  ;;  %p2404_p2 = scmp.lt.u32.totalorder %s2396_s14, %s3134_s30 }
 0x723   : > { %p2398_p8 = pnand %p2397_p6, %p3330_p11 }
 0x724   : > { %p2403_p0 = por %p2402_p13, %p2401_p4 }
 0x725   : > { %p2399_p10 = pneg %p2398_p8 }
 0x726   : > { %p2405_p1 = por %p2404_p2, %p2403_p0 }
 0x728   : > { %p2406_p12 = pnand %p2405_p1, %p2399_p10 }
 0x72a   : > { %2409 = shalt.err (!%p2406_p12)
}
 0x72b   : > { %1904 = dma.vmem_to_hbm [thread:$0]  (%p3330_p11), %s1440_s25, 64, %s3134_s30, %s3140_s6  }
 0x72c   : > { %s1452_s24 = sshll.u32 %s653_s20, 4  ;;  %s3331_s28 = sld [smem:[#allocation53_spill]]  ;;  %s1453_s24 = int_to_ptr.vmem [resolvable:$true] %s1452_s24 }
 0x72d   : > { %s2410_s11 = scalar_lea.vmem %s1453_s24, 64  ;;  %s2577_s8 = smov [#allocation26]  }
 0x72e   : > { %p2411_p7 = scmp.ne.s32.totalorder %s1453_s24, %s2410_s11  ;;  %s2414_s14 = sshll.u32 %s2577_s8, 4  ;;  %s2415_s14 = int_to_ptr.vmem [resolvable:$false] %s2414_s14 }
 0x72f   : > { %s2416_s13 = scalar_lea.vmem %s2415_s14, 128  ;;  %p2417_p9 = scmp.lt.s32.totalorder %s1453_s24, %s2415_s14 }
 0x730   : > { %p2412_p5 = pnand %p2411_p7, %p3330_p11  ;;  %p2418_p6 = scmp.lt.s32.totalorder %s2416_s13, %s2410_s11 }
 0x732   : > { %s3332_s19 = smov %s3331_s28  ;;  %s1450_s21 = scalar_lea.hbm %s3331_s28, %s3326_s16 }
 0x733   : > { %p2413_p3 = pneg %p2412_p5  ;;  %p2419_p8 = por %p2418_p6, %p2417_p9 }
 0x735   : > { %p2420_p10 = pnand %p2419_p8, %p2413_p3 }
 0x737   : > { %2423 = shalt.err (!%p2420_p10)
}
 0x738   : > { %s2424_s20 = scalar_lea.hbm %s1450_s21, 64  ;;  %s2428_s17 = scalar_lea.hbm %s3332_s19, 128 }
 0x739   : > { %p2425_p4 = scmp.ne.s32.totalorder %s1450_s21, %s2424_s20  ;;  %p2429_p2 = scmp.lt.u32.totalorder %s1450_s21, %s3332_s19 }
 0x73a   : > { %p2430_p1 = scmp.lt.u32.totalorder %s2428_s17, %s2424_s20  ;;  %p2432_p7 = scmp.lt.u32.totalorder %s2424_s20, %s1450_s21 }
 0x73b   : > { %p2426_p13 = pnand %p2425_p4, %p3330_p11 }
 0x73c   : > { %p2431_p12 = por %p2430_p1, %p2429_p2 }
 0x73d   : > { %p2427_p0 = pneg %p2426_p13 }
 0x73e   : > { %p2433_p5 = por %p2432_p7, %p2431_p12 }
 0x740   : > { %p2434_p3 = pnand %p2433_p5, %p2427_p0 }
 0x742   : > { %2437 = shalt.err (!%p2434_p3)
}
 0x743   : > { %1905 = dma.vmem_to_hbm [thread:$0]  (%p3330_p11), %s1453_s24, 64, %s1450_s21, %s3140_s6   ;;  %v1757_v24 = vld [vmem:[#allocation20] ss:$0 sm:$0xff]  ;;  %v1758_v26 = vld [vmem:[#allocation21] ss:$0 sm:$0xff] }
 0x744   : > { %s639_s18 = scalar_lea.vmem [#allocation23], %s2996_s0  ;;  %s3333_s11 = sld [smem:[#allocation51_spill]] }
 0x745   : > { %s1426_s15 = sshll.u32 %s639_s18, 4  ;;  %s1402_s24 = scalar_lea.sflag [#allocation7], %s2993_s4  ;;  %s3187_s15 = int_to_ptr.vmem [resolvable:$true] %s1426_s15 }
 0x746   : > { %s2438_s21 = scalar_lea.vmem %s3187_s15, 64  ;;  %s2578_s0 = smov [#allocation23]  }
 0x747   : > { %p2439_p9 = scmp.ne.s32.totalorder %s3187_s15, %s2438_s21  ;;  %s2442_s8 = sshll.u32 %s2578_s0, 4  ;;  %s2443_s8 = int_to_ptr.vmem [resolvable:$false] %s2442_s8 }
 0x748   : > { %s2444_s14 = scalar_lea.vmem %s2443_s8, 128  ;;  %p2445_p10 = scmp.lt.s32.totalorder %s3187_s15, %s2443_s8 }
 0x749   : > { %p2440_p6 = pnand %p2439_p9, %p3330_p11  ;;  %p2446_p4 = scmp.lt.s32.totalorder %s2444_s14, %s2438_s21 }
 0x74a   : > { %s3185_s6 = scalar_lea.hbm %s3333_s11, %s3326_s16 }
 0x74b   : > { %p2441_p8 = pneg %p2440_p6  ;;  %p2447_p13 = por %p2446_p4, %p2445_p10 }
 0x74d   : > { %p2448_p0 = pnand %p2447_p13, %p2441_p8 }
 0x7ab   : > { %v1377_v20 = vpop.xlane.xlu0 %1376 }
 0x7ac   : > { %v1378_v21 = vmul.f32 0.03125, %v1377_v20 }
 0x7ae   : > { %v1379_v22 = vadd.f32 1e-05, %v1378_v21 }
 0x7b0   : > { %2066 = vrsqrt.f32 %v1379_v22 }
 0x7ba   : > { %v2067_v23 = vpop.eup %2066 }
 0x7bb   : > { %v1381_v25 = vmul.f32 %v2067_v23, %v3125_v18 }
 0x7bd   : > { %v1389_v27 = vmul.f32 %v1757_v24, %v1381_v25 }
 0x7bf   : > { %v1397_v28 = vadd.f32 %v1758_v26, %v1389_v27 }
 0x7c1   : > { %v1398_v29 = vpack.c.bf16 %v1397_v28, %v1397_v28 }
 0x7c3   : > { %1400 = vst.msk [vmem:[%s639_s18] sm:$0xf] %vm731_vm2, %v1398_v29 }
 0x7c4   : > { %2451 = shalt.err (!%p2448_p0)
}
 0x7c5   : > { %s2452_s4 = scalar_lea.hbm %s3185_s6, 64  ;;  %s2456_s20 = scalar_lea.hbm %s3333_s11, 128 }
 0x7c6   : > { %p2453_p2 = scmp.ne.s32.totalorder %s3185_s6, %s2452_s4  ;;  %p2457_p7 = scmp.lt.u32.totalorder %s3185_s6, %s3333_s11 }
 0x7c7   : > { %p2458_p5 = scmp.lt.u32.totalorder %s2456_s20, %s2452_s4  ;;  %p2460_p9 = scmp.lt.u32.totalorder %s2452_s4, %s3185_s6 }
 0x7c8   : > { %p2454_p1 = pnand %p2453_p2, %p3330_p11 }
 0x7c9   : > { %p2459_p3 = por %p2458_p5, %p2457_p7 }
 0x7ca   : > { %p2455_p12 = pneg %p2454_p1 }
 0x7cb   : > { %p2461_p6 = por %p2460_p9, %p2459_p3 }
 0x7cd   : > { %p2462_p8 = pnand %p2461_p6, %p2455_p12 }
 0x7cf   : > { %2465 = shalt.err (!%p2462_p8)
}
 0x7d0   : > { %1903 = dma.vmem_to_hbm [thread:$0]  (%p3330_p11), %s3187_s15, 64, %s3185_s6, %s1402_s24  }
 0x7d1 PF: > { %s3334_s17 = sld [smem:[#allocation37_spill]]  ;;  %s3335_s23 = sld [smem:[#allocation41_spill]] }
 0x7d2   : > { %s3336_s27 = sld [smem:[#allocation39_spill]] }
 0x7d7   : > { %s1464_s18 = sand.u32 1, %s3334_s17   ;;  %p3337_p10 = scmp.ne.s32.totalorder %s3335_s23, 0 }
 0x7d8   : > { %p3338_p4 = scmp.ge.s32.totalorder %s3336_s27, 2  ;;  %s1465_s12 = scalar_lea.sflag [#allocation7], %s1464_s18 }
 0x7da   : > { %p1945_p13 = pnand %p3338_p4, %p3337_p10 }
 0x7dc   : > { %2523 = dma.done.wait (!%p1945_p13), %s1465_s12, 64  }
 0x7dd   : > { %2525 = vsyncadd (!%p1945_p13), %s1465_s12, 4294967232  ;;  %s3339_s28 = sadd.s32 4294967294, %s3336_s27  }
 0x7de   : > { %s1473_s21 = sand.u32 1, %s3339_s28  }
 0x7df   : > { %s1474_s0 = scalar_lea.sflag [#allocation25], %s1473_s21 }
 0x7e0   : > { %2527 = dma.done.wait (!%p1945_p13), %s1474_s0, 128  }
 0x7e1   : > { %2529 = vsyncadd (!%p1945_p13), %s1474_s0, 4294967168  ;;  %s38_s30 = sadd.s32 1, %s3336_s27   ;;  %s3340_s22 = sld [smem:[#allocation38_spill]] }
 0x7e2   : > { %p35_p11 = scmp.ge.s32.totalorder %s38_s30, 4   ;;  %s3341_s27 = sld [smem:[#allocation45_spill]] }
 0x7e3   : > { %s3342_s15 = sld [smem:[#allocation43_spill]]  ;;  %s3343_s25 = smov %s2536_s26 }
 0x7e4   : > { %s3345_s28 = smov %s2548_s29  ;;  %37 = sbr.rel (!%p35_p11) target bundleno = 22 (0x16), region = 193 }
 0x7e7   : > { %s3344_s26 = smov %s3340_s22 }
 0x7e9   : > { %s3346_s29 = smov %s3342_s15 }
 0x7eb   :  { %1488 = vsyncpa [#allocation6], 1 }
 0x7ec   :  { %1490 = vsyncpa [#allocation6 + $0x1], 1 }
 0x7ed   :  { %1491 = vsyncpa [#allocation9], 1 }
 0x7ee   :  { %1492 = vsyncpa [#allocation13], 1 }
 0x7ef   :  { %1493 = vsyncpa [#allocation16], 1 }
 0x7f0   :  { %1494 = vsyncpa [#allocation19], 1 }
 0x7f1   :  { %1495 = vsyncpa [#allocation22], 1 }
 0x7f2   :  { %1496 = vsyncpa [#allocation7], 1 }
 0x7f3   :  { %1498 = vsyncpa [#allocation7 + $0x1], 1 }
 0x7f4   :  { %1499 = vsyncpa [#allocation25], 1 }
 0x7f5   :  { %1501 = vsyncpa [#allocation25 + $0x1], 1 }

</bundles_post_ra>
